<compile_context>
chip_gen: v6e
topology: v6e:2x2x1
jax: 0.10.0
libtpu: 0.0.40
codegen_flags: <defaults>
</compile_context>

<pallas_src>
import jax
import jax.numpy as jnp
from jax.experimental import pallas as pl
from jax.experimental.pallas import tpu as pltpu

# ----------------------------- config (scaled-down ViT-B/32) -----------------
BATCH = 2
IMG = 32             # image spatial size (CLIP uses 224)
PATCH = 16           # patch size = conv stride (CLIP uses 32)
GRIDP = IMG // PATCH
NPATCH = GRIDP * GRIDP           # 4
SEQ = NPATCH + 1                 # 5 (CLS + patches)
SEQ_PAD = 8                      # token dim padded to a full sublane tile
WIDTH = 128                      # transformer width (CLIP: 768)
HEADS = 4                        # (CLIP: 12)
HEAD_DIM = WIDTH // HEADS
LAYERS = 2                       # (CLIP: 12)
MLP_DIM = 4 * WIDTH
EMBED = 64                       # output embedding dim (CLIP: 512)
EMBED_PAD = 128                  # lane-dense output; sliced to EMBED outside
PDIM = 3 * PATCH * PATCH         # 768
EPS = 1e-5
NEG_INF = -1e30


# ----------------------------- kernel ----------------------------------------
def _layernorm(x, g, b):
    mu = jnp.mean(x, axis=-1, keepdims=True)
    var = jnp.mean((x - mu) ** 2, axis=-1, keepdims=True)
    return (x - mu) * jax.lax.rsqrt(var + EPS) * g + b


def encoder_kernel(
    patch_ref, wpe_ref, cls_ref, pos_ref, bias_ref,
    lnpre_g, lnpre_b,
    ln1g, ln1b, wqkv, bqkv, wo, bo,
    ln2g, ln2b, w1, b1, w2, b2,
    lnpost_g, lnpost_b, proj_ref,
    o_ref,
    x_sc,
):
    l = pl.program_id(1)
    scale = 1.0 / (HEAD_DIM ** 0.5)

    # ---- first layer step: patch embed, CLS + pos embed, ln_pre -------------
    @pl.when(l == 0)
    def _init():
        emb = jnp.dot(patch_ref[...], wpe_ref[...],
                      preferred_element_type=jnp.float32)        # (NPATCH, W)
        x_sc[0:1, :] = cls_ref[...] + pos_ref[0:1, :]
        x_sc[1:SEQ, :] = emb + pos_ref[1:SEQ, :]
        x_sc[SEQ:, :] = jnp.zeros((SEQ_PAD - SEQ, WIDTH), jnp.float32)
        x_sc[...] = _layernorm(x_sc[...], lnpre_g[...], lnpre_b[...])

    # ---- residual attention block (every grid step) --------------------------
    x = x_sc[...]                                                # (SP, W) f32

    h = _layernorm(x, ln1g[...], ln1b[...]).astype(jnp.bfloat16)
    qkv = jnp.dot(h, wqkv[...], preferred_element_type=jnp.float32) + bqkv[...]
    q = qkv[:, :WIDTH] * scale
    k = qkv[:, WIDTH:2 * WIDTH]
    v = qkv[:, 2 * WIDTH:]

    # (SP, W) -> (HEADS, SP, HEAD_DIM): heads become a leading batch dim.
    qh = pltpu.einshape("shd->hsd", q.reshape(SEQ_PAD, HEADS, HEAD_DIM))
    kh = pltpu.einshape("shd->hsd", k.reshape(SEQ_PAD, HEADS, HEAD_DIM))
    vh = pltpu.einshape("shd->hsd", v.reshape(SEQ_PAD, HEADS, HEAD_DIM))

    s = jnp.einsum('hqd,hkd->hqk',
                   qh.astype(jnp.bfloat16), kh.astype(jnp.bfloat16),
                   preferred_element_type=jnp.float32)           # (H, SP, SP)
    s = s + bias_ref[...].reshape(1, 1, SEQ_PAD)                 # mask pad keys
    m = jnp.max(s, axis=-1, keepdims=True)
    p = jnp.exp(s - m)
    p = p * pl.reciprocal(jnp.sum(p, axis=-1, keepdims=True), approx=True)

    attn = jnp.einsum('hqk,hkd->hqd',
                      p.astype(jnp.bfloat16), vh.astype(jnp.bfloat16),
                      preferred_element_type=jnp.float32)        # (H, SP, HD)
    attn = pltpu.einshape("hsd->shd", attn).reshape(SEQ_PAD, WIDTH)
    attn = jnp.dot(attn.astype(jnp.bfloat16), wo[...],
                   preferred_element_type=jnp.float32) + bo[...]
    x = x + attn

    h = _layernorm(x, ln2g[...], ln2b[...]).astype(jnp.bfloat16)
    h = jnp.dot(h, w1[...], preferred_element_type=jnp.float32) + b1[...]
    h = h * jax.nn.sigmoid(1.702 * h)                            # QuickGELU (f32)
    h = jnp.dot(h.astype(jnp.bfloat16), w2[...],
                preferred_element_type=jnp.float32) + b2[...]
    x_sc[...] = x + h

    # ---- last layer step: ln_post on CLS token + projection ------------------
    @pl.when(l == LAYERS - 1)
    def _head():
        cls_tok = _layernorm(x_sc[0:1, :], lnpost_g[...], lnpost_b[...])
        o_ref[...] = jnp.dot(cls_tok.astype(jnp.bfloat16), proj_ref[...],
                             preferred_element_type=jnp.float32)


# ----------------------------- specs helpers ----------------------------------
def _const(shape):
    zeros = (0,) * len(shape)
    return pl.BlockSpec(shape, lambda b, l: zeros)


def _per_layer(full_shape):
    block = (None,) + tuple(full_shape[1:])
    trail = (0,) * (len(full_shape) - 1)
    return pl.BlockSpec(block, lambda b, l: (l,) + trail)


# ----------------------------- parameter init (deterministic) -----------------
def init_params(key):
    def nrm(k, shape, dtype=jnp.float32, scale=0.02):
        return (scale * jax.random.normal(k, shape, dtype=jnp.float32)).astype(dtype)

    ks = jax.random.split(key, 8)
    pos = nrm(ks[2], (SEQ, WIDTH))
    pos = jnp.concatenate(
        [pos, jnp.zeros((SEQ_PAD - SEQ, WIDTH), jnp.float32)], axis=0)
    proj = nrm(ks[7], (WIDTH, EMBED), jnp.bfloat16)
    proj = jnp.concatenate(
        [proj, jnp.zeros((WIDTH, EMBED_PAD - EMBED), jnp.bfloat16)], axis=1)
    return {
        'w_pe': nrm(ks[0], (PDIM, WIDTH), jnp.bfloat16),   # conv1 as matmul, no bias
        'cls': nrm(ks[1], (1, WIDTH)),
        'pos': pos,
        'ln_pre_g': jnp.ones((1, WIDTH), jnp.float32),
        'ln_pre_b': jnp.zeros((1, WIDTH), jnp.float32),
        'ln1_g': jnp.ones((LAYERS, 1, WIDTH), jnp.float32),
        'ln1_b': jnp.zeros((LAYERS, 1, WIDTH), jnp.float32),
        'wqkv': nrm(ks[3], (LAYERS, WIDTH, 3 * WIDTH), jnp.bfloat16),
        'bqkv': jnp.zeros((LAYERS, 1, 3 * WIDTH), jnp.float32),
        'wo': nrm(ks[4], (LAYERS, WIDTH, WIDTH), jnp.bfloat16),
        'bo': jnp.zeros((LAYERS, 1, WIDTH), jnp.float32),
        'ln2_g': jnp.ones((LAYERS, 1, WIDTH), jnp.float32),
        'ln2_b': jnp.zeros((LAYERS, 1, WIDTH), jnp.float32),
        'w1': nrm(ks[5], (LAYERS, WIDTH, MLP_DIM), jnp.bfloat16),
        'b1': jnp.zeros((LAYERS, 1, MLP_DIM), jnp.float32),
        'w2': nrm(ks[6], (LAYERS, MLP_DIM, WIDTH), jnp.bfloat16),
        'b2': jnp.zeros((LAYERS, 1, WIDTH), jnp.float32),
        'ln_post_g': jnp.ones((1, WIDTH), jnp.float32),
        'ln_post_b': jnp.zeros((1, WIDTH), jnp.float32),
        'proj': proj,
    }


# ----------------------------- forward ----------------------------------------
def extract_patches(images):
    """(B, 3, H, W) NCHW -> (B, NPATCH, 3*PATCH*PATCH); same patch order as
    CLIP's conv1 + reshape + permute (plain-JAX glue outside the kernel)."""
    B, C, H, W = images.shape
    x = images.reshape(B, C, GRIDP, PATCH, GRIDP, PATCH)
    x = x.transpose(0, 2, 4, 1, 3, 5)
    return x.reshape(B, NPATCH, C * PATCH * PATCH)


def mm_encoder_forward(images, params):
    B = images.shape[0]
    patches = extract_patches(images).astype(jnp.bfloat16)      # (B, NPATCH, PDIM)
    attn_bias = jnp.where(jnp.arange(SEQ_PAD) < SEQ, 0.0, NEG_INF)
    attn_bias = attn_bias.astype(jnp.float32).reshape(1, SEQ_PAD)

    in_specs = [
        pl.BlockSpec((None, NPATCH, PDIM), lambda b, l: (b, 0, 0)),   # patches
        _const((PDIM, WIDTH)),                                        # w_pe
        _const((1, WIDTH)),                                           # cls
        _const((SEQ_PAD, WIDTH)),                                     # pos
        _const((1, SEQ_PAD)),                                         # attn_bias
        _const((1, WIDTH)), _const((1, WIDTH)),                       # ln_pre g/b
        _per_layer((LAYERS, 1, WIDTH)), _per_layer((LAYERS, 1, WIDTH)),   # ln1 g/b
        _per_layer((LAYERS, WIDTH, 3 * WIDTH)),                       # wqkv
        _per_layer((LAYERS, 1, 3 * WIDTH)),                           # bqkv
        _per_layer((LAYERS, WIDTH, WIDTH)),                           # wo
        _per_layer((LAYERS, 1, WIDTH)),                               # bo
        _per_layer((LAYERS, 1, WIDTH)), _per_layer((LAYERS, 1, WIDTH)),   # ln2 g/b
        _per_layer((LAYERS, WIDTH, MLP_DIM)),                         # w1
        _per_layer((LAYERS, 1, MLP_DIM)),                             # b1
        _per_layer((LAYERS, MLP_DIM, WIDTH)),                         # w2
        _per_layer((LAYERS, 1, WIDTH)),                               # b2
        _const((1, WIDTH)), _const((1, WIDTH)),                       # ln_post g/b
        _const((WIDTH, EMBED_PAD)),                                   # proj (padded)
    ]
    out_spec = pl.BlockSpec((None, 1, EMBED_PAD), lambda b, l: (b, 0, 0))

    out = pl.pallas_call(
        encoder_kernel,
        grid=(B, LAYERS),
        in_specs=in_specs,
        out_specs=out_spec,
        out_shape=jax.ShapeDtypeStruct((B, 1, EMBED_PAD), jnp.float32),
        scratch_shapes=[pltpu.VMEM((SEQ_PAD, WIDTH), jnp.float32)],
        compiler_params=pltpu.CompilerParams(
            dimension_semantics=("parallel", "arbitrary"),
            vmem_limit_bytes=48 * 1024 * 1024,
        ),
    )(
        patches, params['w_pe'], params['cls'], params['pos'], attn_bias,
        params['ln_pre_g'], params['ln_pre_b'],
        params['ln1_g'], params['ln1_b'], params['wqkv'], params['bqkv'],
        params['wo'], params['bo'], params['ln2_g'], params['ln2_b'],
        params['w1'], params['b1'], params['w2'], params['b2'],
        params['ln_post_g'], params['ln_post_b'], params['proj'],
    )

    # torch.stack -> torch.squeeze -> .float(); use explicit reshape instead of
    # squeeze() so the batch dim survives even when B == 1.
    return out.reshape(B, EMBED_PAD)[:, :EMBED].astype(jnp.float32)


if __name__ == "__main__":
    key = jax.random.PRNGKey(0)
    k_params, k_img = jax.random.split(key)
    params = init_params(k_params)
    # "preprocessed" images (what CLIP's preprocess would have produced)
    images = jax.random.normal(k_img, (BATCH, 3, IMG, IMG), dtype=jnp.float32)

    fwd = jax.jit(mm_encoder_forward)
    out = jax.block_until_ready(fwd(images, params))
    assert out.shape == (BATCH, EMBED), out.shape
    assert out.dtype == jnp.float32
    print("KERNEL_OK")
</pallas_src>

<mosaic_0001>
module attributes {stable_mosaic.version = 11 : i64} {
  func.func @encoder_kernel(%arg0: i32, %arg1: i32, %arg2: memref<1x4x768xbf16, #tpu.memory_space<vmem>>, %arg3: memref<768x128xbf16, #tpu.memory_space<vmem>>, %arg4: memref<1x128xf32, #tpu.memory_space<vmem>>, %arg5: memref<8x128xf32, #tpu.memory_space<vmem>>, %arg6: memref<1x8xf32, #tpu.memory_space<vmem>>, %arg7: memref<1x128xf32, #tpu.memory_space<vmem>>, %arg8: memref<1x128xf32, #tpu.memory_space<vmem>>, %arg9: memref<1x1x128xf32, #tpu.memory_space<vmem>>, %arg10: memref<1x1x128xf32, #tpu.memory_space<vmem>>, %arg11: memref<1x128x384xbf16, #tpu.memory_space<vmem>>, %arg12: memref<1x1x384xf32, #tpu.memory_space<vmem>>, %arg13: memref<1x128x128xbf16, #tpu.memory_space<vmem>>, %arg14: memref<1x1x128xf32, #tpu.memory_space<vmem>>, %arg15: memref<1x1x128xf32, #tpu.memory_space<vmem>>, %arg16: memref<1x1x128xf32, #tpu.memory_space<vmem>>, %arg17: memref<1x128x512xbf16, #tpu.memory_space<vmem>>, %arg18: memref<1x1x512xf32, #tpu.memory_space<vmem>>, %arg19: memref<1x512x128xbf16, #tpu.memory_space<vmem>>, %arg20: memref<1x1x128xf32, #tpu.memory_space<vmem>>, %arg21: memref<1x128xf32, #tpu.memory_space<vmem>>, %arg22: memref<1x128xf32, #tpu.memory_space<vmem>>, %arg23: memref<128x128xbf16, #tpu.memory_space<vmem>>, %arg24: memref<1x1x128xf32, #tpu.memory_space<vmem>>, %arg25: memref<8x128xf32, #tpu.memory_space<vmem>>) attributes {dimension_semantics = [#tpu.dimension_semantics<parallel>, #tpu.dimension_semantics<arbitrary>], iteration_bounds = array<i64: 2, 2>, scalar_prefetch = 0 : i64, scratch_operands = 1 : i64, tpu.core_type = #tpu.core_type<tc>, window_params = [{transform_indices = @transform_0, window_bounds = array<i64: 1, 4, 768>}, {pipeline_mode = #tpu.pipeline_mode<synchronous>, transform_indices = @transform_1, window_bounds = array<i64: 768, 128>}, {pipeline_mode = #tpu.pipeline_mode<synchronous>, transform_indices = @transform_2, window_bounds = array<i64: 1, 128>}, {pipeline_mode = #tpu.pipeline_mode<synchronous>, transform_indices = @transform_3, window_bounds = array<i64: 8, 128>}, {pipeline_mode = #tpu.pipeline_mode<synchronous>, transform_indices = @transform_4, window_bounds = array<i64: 1, 8>}, {pipeline_mode = #tpu.pipeline_mode<synchronous>, transform_indices = @transform_5, window_bounds = array<i64: 1, 128>}, {pipeline_mode = #tpu.pipeline_mode<synchronous>, transform_indices = @transform_6, window_bounds = array<i64: 1, 128>}, {transform_indices = @transform_7, window_bounds = array<i64: 1, 1, 128>}, {transform_indices = @transform_8, window_bounds = array<i64: 1, 1, 128>}, {transform_indices = @transform_9, window_bounds = array<i64: 1, 128, 384>}, {transform_indices = @transform_10, window_bounds = array<i64: 1, 1, 384>}, {transform_indices = @transform_11, window_bounds = array<i64: 1, 128, 128>}, {transform_indices = @transform_12, window_bounds = array<i64: 1, 1, 128>}, {transform_indices = @transform_13, window_bounds = array<i64: 1, 1, 128>}, {transform_indices = @transform_14, window_bounds = array<i64: 1, 1, 128>}, {transform_indices = @transform_15, window_bounds = array<i64: 1, 128, 512>}, {transform_indices = @transform_16, window_bounds = array<i64: 1, 1, 512>}, {transform_indices = @transform_17, window_bounds = array<i64: 1, 512, 128>}, {transform_indices = @transform_18, window_bounds = array<i64: 1, 1, 128>}, {pipeline_mode = #tpu.pipeline_mode<synchronous>, transform_indices = @transform_19, window_bounds = array<i64: 1, 128>}, {pipeline_mode = #tpu.pipeline_mode<synchronous>, transform_indices = @transform_20, window_bounds = array<i64: 1, 128>}, {pipeline_mode = #tpu.pipeline_mode<synchronous>, transform_indices = @transform_21, window_bounds = array<i64: 128, 128>}, {transform_indices = @transform_22, window_bounds = array<i64: 1, 1, 128>}]} {
    %c0_i32 = arith.constant 0 : i32
    %0 = arith.cmpi eq, %arg1, %c0_i32 : i32
    %1 = arith.extui %0 : i1 to i32
    %c0_i32_0 = arith.constant 0 : i32
    %2 = arith.cmpi ne, %1, %c0_i32_0 : i32
    scf.if %2 {
      %c0_63 = arith.constant 0 : index
      %c0_64 = arith.constant 0 : index
      %c0_65 = arith.constant 0 : index
      %135 = vector.load %arg2[%c0_63, %c0_64, %c0_65] : memref<1x4x768xbf16, #tpu.memory_space<vmem>>, vector<1x4x768xbf16>
      %136 = vector.shape_cast %135 : vector<1x4x768xbf16> to vector<4x768xbf16>
      %c0_66 = arith.constant 0 : index
      %c0_67 = arith.constant 0 : index
      %137 = vector.load %arg3[%c0_66, %c0_67] : memref<768x128xbf16, #tpu.memory_space<vmem>>, vector<768x128xbf16>
      %cst_68 = arith.constant dense<0.000000e+00> : vector<4x128xf32>
      %138 = tpu.matmul %136, %137, %cst_68 {dimension_numbers = #tpu.dot_dimension_numbers<[1], [0], [0], [1], [0, 0, 1, 1], [], []>} : vector<4x768xbf16>, vector<768x128xbf16>, vector<4x128xf32> -> vector<4x128xf32>
      %c0_69 = arith.constant 0 : index
      %c0_70 = arith.constant 0 : index
      %139 = vector.load %arg4[%c0_69, %c0_70] : memref<1x128xf32, #tpu.memory_space<vmem>>, vector<1x128xf32>
      %c0_71 = arith.constant 0 : index
      %c0_72 = arith.constant 0 : index
      %140 = vector.load %arg5[%c0_71, %c0_72] : memref<8x128xf32, #tpu.memory_space<vmem>>, vector<1x128xf32>
      %141 = arith.addf %139, %140 : vector<1x128xf32>
      %c0_73 = arith.constant 0 : index
      %c0_74 = arith.constant 0 : index
      %142 = vector.load %arg25[%c0_73, %c0_74] : memref<8x128xf32, #tpu.memory_space<vmem>>, vector<1x128xf32>
      tpu.vector_store %arg25[%c0_73, %c0_74], %141 {strides = array<i32>} : memref<8x128xf32, #tpu.memory_space<vmem>>, vector<1x128xf32>,
      %c1 = arith.constant 1 : index
      %c0_75 = arith.constant 0 : index
      %143 = vector.load %arg5[%c1, %c0_75] : memref<8x128xf32, #tpu.memory_space<vmem>>, vector<4x128xf32>
      %144 = arith.addf %138, %143 : vector<4x128xf32>
      %c1_76 = arith.constant 1 : index
      %c0_77 = arith.constant 0 : index
      %145 = vector.load %arg25[%c1_76, %c0_77] : memref<8x128xf32, #tpu.memory_space<vmem>>, vector<4x128xf32>
      tpu.vector_store %arg25[%c1_76, %c0_77], %144 {strides = array<i32>} : memref<8x128xf32, #tpu.memory_space<vmem>>, vector<4x128xf32>,
      %cst_78 = arith.constant 0.000000e+00 : f32
      %146 = vector.broadcast %cst_78 : f32 to vector<3x128xf32>
      %c5 = arith.constant 5 : index
      %c0_79 = arith.constant 0 : index
      %147 = vector.load %arg25[%c5, %c0_79] : memref<8x128xf32, #tpu.memory_space<vmem>>, vector<3x128xf32>
      tpu.vector_store %arg25[%c5, %c0_79], %146 {strides = array<i32>} : memref<8x128xf32, #tpu.memory_space<vmem>>, vector<3x128xf32>,
      %c0_80 = arith.constant 0 : index
      %c0_81 = arith.constant 0 : index
      %148 = vector.load %arg25[%c0_80, %c0_81] : memref<8x128xf32, #tpu.memory_space<vmem>>, vector<8x128xf32>
      %c0_82 = arith.constant 0 : index
      %c0_83 = arith.constant 0 : index
      %149 = vector.load %arg7[%c0_82, %c0_83] : memref<1x128xf32, #tpu.memory_space<vmem>>, vector<1x128xf32>
      %c0_84 = arith.constant 0 : index
      %c0_85 = arith.constant 0 : index
      %150 = vector.load %arg8[%c0_84, %c0_85] : memref<1x128xf32, #tpu.memory_space<vmem>>, vector<1x128xf32>
      %cst_86 = arith.constant dense<0.000000e+00> : vector<8xf32>
      %151 = vector.multi_reduction <add>, %148, %cst_86 [1] : vector<8x128xf32> to vector<8xf32>
      %152 = vector.shape_cast %151 : vector<8xf32> to vector<8x1xf32>
      %cst_87 = arith.constant 1.280000e+02 : f32
      %153 = vector.broadcast %cst_87 : f32 to vector<8x1xf32>
      %154 = arith.divf %152, %153 : vector<8x1xf32>
      %155 = vector.broadcast %154 : vector<8x1xf32> to vector<8x128xf32>
      %156 = arith.subf %148, %155 : vector<8x128xf32>
      %157 = arith.mulf %156, %156 : vector<8x128xf32>
      %cst_88 = arith.constant dense<0.000000e+00> : vector<8xf32>
      %158 = vector.multi_reduction <add>, %157, %cst_88 [1] : vector<8x128xf32> to vector<8xf32>
      %159 = vector.shape_cast %158 : vector<8xf32> to vector<8x1xf32>
      %cst_89 = arith.constant 1.280000e+02 : f32
      %160 = vector.broadcast %cst_89 : f32 to vector<8x1xf32>
      %161 = arith.divf %159, %160 : vector<8x1xf32>
      %162 = vector.broadcast %154 : vector<8x1xf32> to vector<8x128xf32>
      %163 = arith.subf %148, %162 : vector<8x128xf32>
      %cst_90 = arith.constant 9.99999974E-6 : f32
      %164 = vector.broadcast %cst_90 : f32 to vector<8x1xf32>
      %165 = arith.addf %161, %164 : vector<8x1xf32>
      %166 = math.rsqrt %165 : vector<8x1xf32>
      %167 = vector.broadcast %166 : vector<8x1xf32> to vector<8x128xf32>
      %168 = arith.mulf %163, %167 : vector<8x128xf32>
      %169 = vector.broadcast %149 : vector<1x128xf32> to vector<8x128xf32>
      %170 = arith.mulf %168, %169 : vector<8x128xf32>
      %171 = vector.broadcast %150 : vector<1x128xf32> to vector<8x128xf32>
      %172 = arith.addf %170, %171 : vector<8x128xf32>
      %c0_91 = arith.constant 0 : index
      %c0_92 = arith.constant 0 : index
      %173 = vector.load %arg25[%c0_91, %c0_92] : memref<8x128xf32, #tpu.memory_space<vmem>>, vector<8x128xf32>
      tpu.vector_store %arg25[%c0_91, %c0_92], %172 {strides = array<i32>} : memref<8x128xf32, #tpu.memory_space<vmem>>, vector<8x128xf32>,
    } else {
    }
    %c0 = arith.constant 0 : index
    %c0_1 = arith.constant 0 : index
    %3 = vector.load %arg25[%c0, %c0_1] : memref<8x128xf32, #tpu.memory_space<vmem>>, vector<8x128xf32>
    %c0_2 = arith.constant 0 : index
    %c0_3 = arith.constant 0 : index
    %c0_4 = arith.constant 0 : index
    %4 = vector.load %arg9[%c0_2, %c0_3, %c0_4] : memref<1x1x128xf32, #tpu.memory_space<vmem>>, vector<1x1x128xf32>
    %5 = vector.shape_cast %4 : vector<1x1x128xf32> to vector<1x128xf32>
    %c0_5 = arith.constant 0 : index
    %c0_6 = arith.constant 0 : index
    %c0_7 = arith.constant 0 : index
    %6 = vector.load %arg10[%c0_5, %c0_6, %c0_7] : memref<1x1x128xf32, #tpu.memory_space<vmem>>, vector<1x1x128xf32>
    %7 = vector.shape_cast %6 : vector<1x1x128xf32> to vector<1x128xf32>
    %cst = arith.constant dense<0.000000e+00> : vector<8xf32>
    %8 = vector.multi_reduction <add>, %3, %cst [1] : vector<8x128xf32> to vector<8xf32>
    %9 = vector.shape_cast %8 : vector<8xf32> to vector<8x1xf32>
    %cst_8 = arith.constant 1.280000e+02 : f32
    %10 = vector.broadcast %cst_8 : f32 to vector<8x1xf32>
    %11 = arith.divf %9, %10 : vector<8x1xf32>
    %12 = vector.broadcast %11 : vector<8x1xf32> to vector<8x128xf32>
    %13 = arith.subf %3, %12 : vector<8x128xf32>
    %14 = arith.mulf %13, %13 : vector<8x128xf32>
    %cst_9 = arith.constant dense<0.000000e+00> : vector<8xf32>
    %15 = vector.multi_reduction <add>, %14, %cst_9 [1] : vector<8x128xf32> to vector<8xf32>
    %16 = vector.shape_cast %15 : vector<8xf32> to vector<8x1xf32>
    %cst_10 = arith.constant 1.280000e+02 : f32
    %17 = vector.broadcast %cst_10 : f32 to vector<8x1xf32>
    %18 = arith.divf %16, %17 : vector<8x1xf32>
    %19 = vector.broadcast %11 : vector<8x1xf32> to vector<8x128xf32>
    %20 = arith.subf %3, %19 : vector<8x128xf32>
    %cst_11 = arith.constant 9.99999974E-6 : f32
    %21 = vector.broadcast %cst_11 : f32 to vector<8x1xf32>
    %22 = arith.addf %18, %21 : vector<8x1xf32>
    %23 = math.rsqrt %22 : vector<8x1xf32>
    %24 = vector.broadcast %23 : vector<8x1xf32> to vector<8x128xf32>
    %25 = arith.mulf %20, %24 : vector<8x128xf32>
    %26 = vector.broadcast %5 : vector<1x128xf32> to vector<8x128xf32>
    %27 = arith.mulf %25, %26 : vector<8x128xf32>
    %28 = vector.broadcast %7 : vector<1x128xf32> to vector<8x128xf32>
    %29 = arith.addf %27, %28 : vector<8x128xf32>
    %30 = arith.truncf %29 : vector<8x128xf32> to vector<8x128xbf16>
    %c0_12 = arith.constant 0 : index
    %c0_13 = arith.constant 0 : index
    %c0_14 = arith.constant 0 : index
    %31 = vector.load %arg11[%c0_12, %c0_13, %c0_14] : memref<1x128x384xbf16, #tpu.memory_space<vmem>>, vector<1x128x384xbf16>
    %32 = vector.shape_cast %31 : vector<1x128x384xbf16> to vector<128x384xbf16>
    %cst_15 = arith.constant dense<0.000000e+00> : vector<8x384xf32>
    %33 = tpu.matmul %30, %32, %cst_15 {dimension_numbers = #tpu.dot_dimension_numbers<[1], [0], [0], [1], [0, 0, 1, 1], [], []>} : vector<8x128xbf16>, vector<128x384xbf16>, vector<8x384xf32> -> vector<8x384xf32>
    %c0_16 = arith.constant 0 : index
    %c0_17 = arith.constant 0 : index
    %c0_18 = arith.constant 0 : index
    %34 = vector.load %arg12[%c0_16, %c0_17, %c0_18] : memref<1x1x384xf32, #tpu.memory_space<vmem>>, vector<1x1x384xf32>
    %35 = vector.shape_cast %34 : vector<1x1x384xf32> to vector<1x384xf32>
    %36 = vector.broadcast %35 : vector<1x384xf32> to vector<8x384xf32>
    %37 = arith.addf %33, %36 : vector<8x384xf32>
    %38 = vector.extract_strided_slice %37 {offsets = [0, 0], sizes = [8, 128], strides = [1, 1]} : vector<8x384xf32> to vector<8x128xf32>
    %cst_19 = arith.constant 0.176776692 : f32
    %39 = vector.broadcast %cst_19 : f32 to vector<8x128xf32>
    %40 = arith.mulf %38, %39 : vector<8x128xf32>
    %41 = vector.extract_strided_slice %37 {offsets = [0, 128], sizes = [8, 128], strides = [1, 1]} : vector<8x384xf32> to vector<8x128xf32>
    %42 = vector.extract_strided_slice %37 {offsets = [0, 256], sizes = [8, 128], strides = [1, 1]} : vector<8x384xf32> to vector<8x128xf32>
    %43 = vector.shape_cast %40 : vector<8x128xf32> to vector<8x4x32xf32>
    %44 = tpu.transpose %43, [1, 0, 2] : vector<8x4x32xf32> -> vector<4x8x32xf32>
    %45 = vector.shape_cast %41 : vector<8x128xf32> to vector<8x4x32xf32>
    %46 = tpu.transpose %45, [1, 0, 2] : vector<8x4x32xf32> -> vector<4x8x32xf32>
    %47 = vector.shape_cast %42 : vector<8x128xf32> to vector<8x4x32xf32>
    %48 = tpu.transpose %47, [1, 0, 2] : vector<8x4x32xf32> -> vector<4x8x32xf32>
    %49 = arith.truncf %44 : vector<4x8x32xf32> to vector<4x8x32xbf16>
    %50 = arith.truncf %46 : vector<4x8x32xf32> to vector<4x8x32xbf16>
    "tpu.trace_start"() <{level = 10 : i32, message = "hqd,hkd->hqk"}> : () -> ()
    %cst_20 = arith.constant dense<0.000000e+00> : vector<4x8x8xf32>
    %51 = tpu.matmul %49, %50, %cst_20 {dimension_numbers = #tpu.dot_dimension_numbers<[2], [2], [1], [1], [0, 0, 0, 1, 1, 1], [0], [0]>} : vector<4x8x32xbf16>, vector<4x8x32xbf16>, vector<4x8x8xf32> -> vector<4x8x8xf32>
    "tpu.trace_stop"() : () -> ()
    %c0_21 = arith.constant 0 : index
    %c0_22 = arith.constant 0 : index
    %52 = vector.load %arg6[%c0_21, %c0_22] : memref<1x8xf32, #tpu.memory_space<vmem>>, vector<1x8xf32>
    %53 = vector.shape_cast %52 : vector<1x8xf32> to vector<1x1x8xf32>
    %54 = vector.broadcast %53 : vector<1x1x8xf32> to vector<4x8x8xf32>
    %55 = arith.addf %51, %54 : vector<4x8x8xf32>
    %cst_23 = arith.constant dense<0xFF800000> : vector<4x8xf32>
    %56 = vector.multi_reduction <maximumf>, %55, %cst_23 [2] : vector<4x8x8xf32> to vector<4x8xf32>
    %57 = vector.shape_cast %56 : vector<4x8xf32> to vector<4x8x1xf32>
    %58 = vector.broadcast %57 : vector<4x8x1xf32> to vector<4x8x8xf32>
    %59 = arith.subf %55, %58 : vector<4x8x8xf32>
    %60 = math.exp %59 : vector<4x8x8xf32>
    %cst_24 = arith.constant dense<0.000000e+00> : vector<4x8xf32>
    %61 = vector.multi_reduction <add>, %60, %cst_24 [2] : vector<4x8x8xf32> to vector<4x8xf32>
    %62 = vector.shape_cast %61 : vector<4x8xf32> to vector<4x8x1xf32>
    %63 = tpu.reciprocal %62 {approx = true} : vector<4x8x1xf32> -> vector<4x8x1xf32>
    %64 = vector.broadcast %63 : vector<4x8x1xf32> to vector<4x8x8xf32>
    %65 = arith.mulf %60, %64 : vector<4x8x8xf32>
    %66 = arith.truncf %65 : vector<4x8x8xf32> to vector<4x8x8xbf16>
    %67 = arith.truncf %48 : vector<4x8x32xf32> to vector<4x8x32xbf16>
    "tpu.trace_start"() <{level = 10 : i32, message = "hqk,hkd->hqd"}> : () -> ()
    %cst_25 = arith.constant dense<0.000000e+00> : vector<4x8x32xf32>
    %68 = tpu.matmul %66, %67, %cst_25 {dimension_numbers = #tpu.dot_dimension_numbers<[2], [1], [1], [2], [0, 0, 0, 1, 1, 2], [0], [0]>} : vector<4x8x8xbf16>, vector<4x8x32xbf16>, vector<4x8x32xf32> -> vector<4x8x32xf32>
    "tpu.trace_stop"() : () -> ()
    %69 = tpu.transpose %68, [1, 0, 2] : vector<4x8x32xf32> -> vector<8x4x32xf32>
    %70 = vector.shape_cast %69 : vector<8x4x32xf32> to vector<8x128xf32>
    %71 = arith.truncf %70 : vector<8x128xf32> to vector<8x128xbf16>
    %c0_26 = arith.constant 0 : index
    %c0_27 = arith.constant 0 : index
    %c0_28 = arith.constant 0 : index
    %72 = vector.load %arg13[%c0_26, %c0_27, %c0_28] : memref<1x128x128xbf16, #tpu.memory_space<vmem>>, vector<1x128x128xbf16>
    %73 = vector.shape_cast %72 : vector<1x128x128xbf16> to vector<128x128xbf16>
    %cst_29 = arith.constant dense<0.000000e+00> : vector<8x128xf32>
    %74 = tpu.matmul %71, %73, %cst_29 {dimension_numbers = #tpu.dot_dimension_numbers<[1], [0], [0], [1], [0, 0, 1, 1], [], []>} : vector<8x128xbf16>, vector<128x128xbf16>, vector<8x128xf32> -> vector<8x128xf32>
    %c0_30 = arith.constant 0 : index
    %c0_31 = arith.constant 0 : index
    %c0_32 = arith.constant 0 : index
    %75 = vector.load %arg14[%c0_30, %c0_31, %c0_32] : memref<1x1x128xf32, #tpu.memory_space<vmem>>, vector<1x1x128xf32>
    %76 = vector.shape_cast %75 : vector<1x1x128xf32> to vector<1x128xf32>
    %77 = vector.broadcast %76 : vector<1x128xf32> to vector<8x128xf32>
    %78 = arith.addf %74, %77 : vector<8x128xf32>
    %79 = arith.addf %3, %78 : vector<8x128xf32>
    %c0_33 = arith.constant 0 : index
    %c0_34 = arith.constant 0 : index
    %c0_35 = arith.constant 0 : index
    %80 = vector.load %arg15[%c0_33, %c0_34, %c0_35] : memref<1x1x128xf32, #tpu.memory_space<vmem>>, vector<1x1x128xf32>
    %81 = vector.shape_cast %80 : vector<1x1x128xf32> to vector<1x128xf32>
    %c0_36 = arith.constant 0 : index
    %c0_37 = arith.constant 0 : index
    %c0_38 = arith.constant 0 : index
    %82 = vector.load %arg16[%c0_36, %c0_37, %c0_38] : memref<1x1x128xf32, #tpu.memory_space<vmem>>, vector<1x1x128xf32>
    %83 = vector.shape_cast %82 : vector<1x1x128xf32> to vector<1x128xf32>
    %cst_39 = arith.constant dense<0.000000e+00> : vector<8xf32>
    %84 = vector.multi_reduction <add>, %79, %cst_39 [1] : vector<8x128xf32> to vector<8xf32>
    %85 = vector.shape_cast %84 : vector<8xf32> to vector<8x1xf32>
    %cst_40 = arith.constant 1.280000e+02 : f32
    %86 = vector.broadcast %cst_40 : f32 to vector<8x1xf32>
    %87 = arith.divf %85, %86 : vector<8x1xf32>
    %88 = vector.broadcast %87 : vector<8x1xf32> to vector<8x128xf32>
    %89 = arith.subf %79, %88 : vector<8x128xf32>
    %90 = arith.mulf %89, %89 : vector<8x128xf32>
    %cst_41 = arith.constant dense<0.000000e+00> : vector<8xf32>
    %91 = vector.multi_reduction <add>, %90, %cst_41 [1] : vector<8x128xf32> to vector<8xf32>
    %92 = vector.shape_cast %91 : vector<8xf32> to vector<8x1xf32>
    %cst_42 = arith.constant 1.280000e+02 : f32
    %93 = vector.broadcast %cst_42 : f32 to vector<8x1xf32>
    %94 = arith.divf %92, %93 : vector<8x1xf32>
    %95 = vector.broadcast %87 : vector<8x1xf32> to vector<8x128xf32>
    %96 = arith.subf %79, %95 : vector<8x128xf32>
    %cst_43 = arith.constant 9.99999974E-6 : f32
    %97 = vector.broadcast %cst_43 : f32 to vector<8x1xf32>
    %98 = arith.addf %94, %97 : vector<8x1xf32>
    %99 = math.rsqrt %98 : vector<8x1xf32>
    %100 = vector.broadcast %99 : vector<8x1xf32> to vector<8x128xf32>
    %101 = arith.mulf %96, %100 : vector<8x128xf32>
    %102 = vector.broadcast %81 : vector<1x128xf32> to vector<8x128xf32>
    %103 = arith.mulf %101, %102 : vector<8x128xf32>
    %104 = vector.broadcast %83 : vector<1x128xf32> to vector<8x128xf32>
    %105 = arith.addf %103, %104 : vector<8x128xf32>
    %106 = arith.truncf %105 : vector<8x128xf32> to vector<8x128xbf16>
    %c0_44 = arith.constant 0 : index
    %c0_45 = arith.constant 0 : index
    %c0_46 = arith.constant 0 : index
    %107 = vector.load %arg17[%c0_44, %c0_45, %c0_46] : memref<1x128x512xbf16, #tpu.memory_space<vmem>>, vector<1x128x512xbf16>
    %108 = vector.shape_cast %107 : vector<1x128x512xbf16> to vector<128x512xbf16>
    %cst_47 = arith.constant dense<0.000000e+00> : vector<8x512xf32>
    %109 = tpu.matmul %106, %108, %cst_47 {dimension_numbers = #tpu.dot_dimension_numbers<[1], [0], [0], [1], [0, 0, 1, 1], [], []>} : vector<8x128xbf16>, vector<128x512xbf16>, vector<8x512xf32> -> vector<8x512xf32>
    %c0_48 = arith.constant 0 : index
    %c0_49 = arith.constant 0 : index
    %c0_50 = arith.constant 0 : index
    %110 = vector.load %arg18[%c0_48, %c0_49, %c0_50] : memref<1x1x512xf32, #tpu.memory_space<vmem>>, vector<1x1x512xf32>
    %111 = vector.shape_cast %110 : vector<1x1x512xf32> to vector<1x512xf32>
    %112 = vector.broadcast %111 : vector<1x512xf32> to vector<8x512xf32>
    %113 = arith.addf %109, %112 : vector<8x512xf32>
    %cst_51 = arith.constant 1.702000e+00 : f32
    %114 = vector.broadcast %cst_51 : f32 to vector<8x512xf32>
    %115 = arith.mulf %114, %113 : vector<8x512xf32>
    %116 = arith.negf %115 : vector<8x512xf32>
    %117 = math.exp %116 : vector<8x512xf32>
    %cst_52 = arith.constant 1.000000e+00 : f32
    %118 = vector.broadcast %cst_52 : f32 to vector<8x512xf32>
    %119 = arith.addf %118, %117 : vector<8x512xf32>
    %120 = arith.divf %118, %119 : vector<8x512xf32>
    %121 = arith.mulf %113, %120 : vector<8x512xf32>
    %122 = arith.truncf %121 : vector<8x512xf32> to vector<8x512xbf16>
    %c0_53 = arith.constant 0 : index
    %c0_54 = arith.constant 0 : index
    %c0_55 = arith.constant 0 : index
    %123 = vector.load %arg19[%c0_53, %c0_54, %c0_55] : memref<1x512x128xbf16, #tpu.memory_space<vmem>>, vector<1x512x128xbf16>
    %124 = vector.shape_cast %123 : vector<1x512x128xbf16> to vector<512x128xbf16>
    %cst_56 = arith.constant dense<0.000000e+00> : vector<8x128xf32>
    %125 = tpu.matmul %122, %124, %cst_56 {dimension_numbers = #tpu.dot_dimension_numbers<[1], [0], [0], [1], [0, 0, 1, 1], [], []>} : vector<8x512xbf16>, vector<512x128xbf16>, vector<8x128xf32> -> vector<8x128xf32>
    %c0_57 = arith.constant 0 : index
    %c0_58 = arith.constant 0 : index
    %c0_59 = arith.constant 0 : index
    %126 = vector.load %arg20[%c0_57, %c0_58, %c0_59] : memref<1x1x128xf32, #tpu.memory_space<vmem>>, vector<1x1x128xf32>
    %127 = vector.shape_cast %126 : vector<1x1x128xf32> to vector<1x128xf32>
    %128 = vector.broadcast %127 : vector<1x128xf32> to vector<8x128xf32>
    %129 = arith.addf %125, %128 : vector<8x128xf32>
    %130 = arith.addf %79, %129 : vector<8x128xf32>
    %c0_60 = arith.constant 0 : index
    %c0_61 = arith.constant 0 : index
    %131 = vector.load %arg25[%c0_60, %c0_61] : memref<8x128xf32, #tpu.memory_space<vmem>>, vector<8x128xf32>
    tpu.vector_store %arg25[%c0_60, %c0_61], %130 {strides = array<i32>} : memref<8x128xf32, #tpu.memory_space<vmem>>, vector<8x128xf32>,
    %c1_i32 = arith.constant 1 : i32
    %132 = arith.cmpi eq, %arg1, %c1_i32 : i32
    %133 = arith.extui %132 : i1 to i32
    %c0_i32_62 = arith.constant 0 : i32
    %134 = arith.cmpi ne, %133, %c0_i32_62 : i32
    scf.if %134 {
      %c0_63 = arith.constant 0 : index
      %c0_64 = arith.constant 0 : index
      %135 = vector.load %arg25[%c0_63, %c0_64] : memref<8x128xf32, #tpu.memory_space<vmem>>, vector<1x128xf32>
      %c0_65 = arith.constant 0 : index
      %c0_66 = arith.constant 0 : index
      %136 = vector.load %arg21[%c0_65, %c0_66] : memref<1x128xf32, #tpu.memory_space<vmem>>, vector<1x128xf32>
      %c0_67 = arith.constant 0 : index
      %c0_68 = arith.constant 0 : index
      %137 = vector.load %arg22[%c0_67, %c0_68] : memref<1x128xf32, #tpu.memory_space<vmem>>, vector<1x128xf32>
      %cst_69 = arith.constant dense<0.000000e+00> : vector<1xf32>
      %138 = vector.multi_reduction <add>, %135, %cst_69 [1] : vector<1x128xf32> to vector<1xf32>
      %139 = vector.shape_cast %138 : vector<1xf32> to vector<1x1xf32>
      %cst_70 = arith.constant 1.280000e+02 : f32
      %140 = vector.broadcast %cst_70 : f32 to vector<1x1xf32>
      %141 = arith.divf %139, %140 : vector<1x1xf32>
      %142 = vector.broadcast %141 : vector<1x1xf32> to vector<1x128xf32>
      %143 = arith.subf %135, %142 : vector<1x128xf32>
      %144 = arith.mulf %143, %143 : vector<1x128xf32>
      %cst_71 = arith.constant dense<0.000000e+00> : vector<1xf32>
      %145 = vector.multi_reduction <add>, %144, %cst_71 [1] : vector<1x128xf32> to vector<1xf32>
      %146 = vector.shape_cast %145 : vector<1xf32> to vector<1x1xf32>
      %cst_72 = arith.constant 1.280000e+02 : f32
      %147 = vector.broadcast %cst_72 : f32 to vector<1x1xf32>
      %148 = arith.divf %146, %147 : vector<1x1xf32>
      %149 = vector.broadcast %141 : vector<1x1xf32> to vector<1x128xf32>
      %150 = arith.subf %135, %149 : vector<1x128xf32>
      %cst_73 = arith.constant 9.99999974E-6 : f32
      %151 = vector.broadcast %cst_73 : f32 to vector<1x1xf32>
      %152 = arith.addf %148, %151 : vector<1x1xf32>
      %153 = math.rsqrt %152 : vector<1x1xf32>
      %154 = vector.broadcast %153 : vector<1x1xf32> to vector<1x128xf32>
      %155 = arith.mulf %150, %154 : vector<1x128xf32>
      %156 = arith.mulf %155, %136 : vector<1x128xf32>
      %157 = arith.addf %156, %137 : vector<1x128xf32>
      %158 = arith.truncf %157 : vector<1x128xf32> to vector<1x128xbf16>
      %c0_74 = arith.constant 0 : index
      %c0_75 = arith.constant 0 : index
      %159 = vector.load %arg23[%c0_74, %c0_75] : memref<128x128xbf16, #tpu.memory_space<vmem>>, vector<128x128xbf16>
      %cst_76 = arith.constant dense<0.000000e+00> : vector<1x128xf32>
      %160 = tpu.matmul %158, %159, %cst_76 {dimension_numbers = #tpu.dot_dimension_numbers<[1], [0], [0], [1], [0, 0, 1, 1], [], []>} : vector<1x128xbf16>, vector<128x128xbf16>, vector<1x128xf32> -> vector<1x128xf32>
      %c0_77 = arith.constant 0 : index
      %c0_78 = arith.constant 0 : index
      %c0_79 = arith.constant 0 : index
      %161 = vector.load %arg24[%c0_77, %c0_78, %c0_79] : memref<1x1x128xf32, #tpu.memory_space<vmem>>, vector<1x1x128xf32>
      %162 = vector.shape_cast %161 : vector<1x1x128xf32> to vector<1x128xf32>
      %163 = vector.shape_cast %160 : vector<1x128xf32> to vector<1x1x128xf32>
      tpu.vector_store %arg24[%c0_77, %c0_78, %c0_79], %163 {strides = array<i32>} : memref<1x1x128xf32, #tpu.memory_space<vmem>>, vector<1x1x128xf32>,
    } else {
    }
    return
  }
  func.func @transform_0(%arg0: i32, %arg1: i32) -> (i32, i32, i32) {
    %c0_i32 = arith.constant 0 : i32
    %c0_i32_0 = arith.constant 0 : i32
    %c0_i32_1 = arith.constant 0 : i32
    return %arg0, %c0_i32, %c0_i32_0 : i32, i32, i32
  }
  func.func @transform_1(%arg0: i32, %arg1: i32) -> (i32, i32) {
    %c0_i32 = arith.constant 0 : i32
    %c0_i32_0 = arith.constant 0 : i32
    %c0_i32_1 = arith.constant 0 : i32
    return %c0_i32, %c0_i32_0 : i32, i32
  }
  func.func @transform_2(%arg0: i32, %arg1: i32) -> (i32, i32) {
    %c0_i32 = arith.constant 0 : i32
    %c0_i32_0 = arith.constant 0 : i32
    %c0_i32_1 = arith.constant 0 : i32
    return %c0_i32, %c0_i32_0 : i32, i32
  }
  func.func @transform_3(%arg0: i32, %arg1: i32) -> (i32, i32) {
    %c0_i32 = arith.constant 0 : i32
    %c0_i32_0 = arith.constant 0 : i32
    %c0_i32_1 = arith.constant 0 : i32
    return %c0_i32, %c0_i32_0 : i32, i32
  }
  func.func @transform_4(%arg0: i32, %arg1: i32) -> (i32, i32) {
    %c0_i32 = arith.constant 0 : i32
    %c0_i32_0 = arith.constant 0 : i32
    %c0_i32_1 = arith.constant 0 : i32
    return %c0_i32, %c0_i32_0 : i32, i32
  }
  func.func @transform_5(%arg0: i32, %arg1: i32) -> (i32, i32) {
    %c0_i32 = arith.constant 0 : i32
    %c0_i32_0 = arith.constant 0 : i32
    %c0_i32_1 = arith.constant 0 : i32
    return %c0_i32, %c0_i32_0 : i32, i32
  }
  func.func @transform_6(%arg0: i32, %arg1: i32) -> (i32, i32) {
    %c0_i32 = arith.constant 0 : i32
    %c0_i32_0 = arith.constant 0 : i32
    %c0_i32_1 = arith.constant 0 : i32
    return %c0_i32, %c0_i32_0 : i32, i32
  }
  func.func @transform_7(%arg0: i32, %arg1: i32) -> (i32, i32, i32) {
    %c0_i32 = arith.constant 0 : i32
    %c0_i32_0 = arith.constant 0 : i32
    %c0_i32_1 = arith.constant 0 : i32
    return %arg1, %c0_i32, %c0_i32_0 : i32, i32, i32
  }
  func.func @transform_8(%arg0: i32, %arg1: i32) -> (i32, i32, i32) {
    %c0_i32 = arith.constant 0 : i32
    %c0_i32_0 = arith.constant 0 : i32
    %c0_i32_1 = arith.constant 0 : i32
    return %arg1, %c0_i32, %c0_i32_0 : i32, i32, i32
  }
  func.func @transform_9(%arg0: i32, %arg1: i32) -> (i32, i32, i32) {
    %c0_i32 = arith.constant 0 : i32
    %c0_i32_0 = arith.constant 0 : i32
    %c0_i32_1 = arith.constant 0 : i32
    return %arg1, %c0_i32, %c0_i32_0 : i32, i32, i32
  }
  func.func @transform_10(%arg0: i32, %arg1: i32) -> (i32, i32, i32) {
    %c0_i32 = arith.constant 0 : i32
    %c0_i32_0 = arith.constant 0 : i32
    %c0_i32_1 = arith.constant 0 : i32
    return %arg1, %c0_i32, %c0_i32_0 : i32, i32, i32
  }
  func.func @transform_11(%arg0: i32, %arg1: i32) -> (i32, i32, i32) {
    %c0_i32 = arith.constant 0 : i32
    %c0_i32_0 = arith.constant 0 : i32
    %c0_i32_1 = arith.constant 0 : i32
    return %arg1, %c0_i32, %c0_i32_0 : i32, i32, i32
  }
  func.func @transform_12(%arg0: i32, %arg1: i32) -> (i32, i32, i32) {
    %c0_i32 = arith.constant 0 : i32
    %c0_i32_0 = arith.constant 0 : i32
    %c0_i32_1 = arith.constant 0 : i32
    return %arg1, %c0_i32, %c0_i32_0 : i32, i32, i32
  }
  func.func @transform_13(%arg0: i32, %arg1: i32) -> (i32, i32, i32) {
    %c0_i32 = arith.constant 0 : i32
    %c0_i32_0 = arith.constant 0 : i32
    %c0_i32_1 = arith.constant 0 : i32
    return %arg1, %c0_i32, %c0_i32_0 : i32, i32, i32
  }
  func.func @transform_14(%arg0: i32, %arg1: i32) -> (i32, i32, i32) {
    %c0_i32 = arith.constant 0 : i32
    %c0_i32_0 = arith.constant 0 : i32
    %c0_i32_1 = arith.constant 0 : i32
    return %arg1, %c0_i32, %c0_i32_0 : i32, i32, i32
  }
  func.func @transform_15(%arg0: i32, %arg1: i32) -> (i32, i32, i32) {
    %c0_i32 = arith.constant 0 : i32
    %c0_i32_0 = arith.constant 0 : i32
    %c0_i32_1 = arith.constant 0 : i32
    return %arg1, %c0_i32, %c0_i32_0 : i32, i32, i32
  }
  func.func @transform_16(%arg0: i32, %arg1: i32) -> (i32, i32, i32) {
    %c0_i32 = arith.constant 0 : i32
    %c0_i32_0 = arith.constant 0 : i32
    %c0_i32_1 = arith.constant 0 : i32
    return %arg1, %c0_i32, %c0_i32_0 : i32, i32, i32
  }
  func.func @transform_17(%arg0: i32, %arg1: i32) -> (i32, i32, i32) {
    %c0_i32 = arith.constant 0 : i32
    %c0_i32_0 = arith.constant 0 : i32
    %c0_i32_1 = arith.constant 0 : i32
    return %arg1, %c0_i32, %c0_i32_0 : i32, i32, i32
  }
  func.func @transform_18(%arg0: i32, %arg1: i32) -> (i32, i32, i32) {
    %c0_i32 = arith.constant 0 : i32
    %c0_i32_0 = arith.constant 0 : i32
    %c0_i32_1 = arith.constant 0 : i32
    return %arg1, %c0_i32, %c0_i32_0 : i32, i32, i32
  }
  func.func @transform_19(%arg0: i32, %arg1: i32) -> (i32, i32) {
    %c0_i32 = arith.constant 0 : i32
    %c0_i32_0 = arith.constant 0 : i32
    %c0_i32_1 = arith.constant 0 : i32
    return %c0_i32, %c0_i32_0 : i32, i32
  }
  func.func @transform_20(%arg0: i32, %arg1: i32) -> (i32, i32) {
    %c0_i32 = arith.constant 0 : i32
    %c0_i32_0 = arith.constant 0 : i32
    %c0_i32_1 = arith.constant 0 : i32
    return %c0_i32, %c0_i32_0 : i32, i32
  }
  func.func @transform_21(%arg0: i32, %arg1: i32) -> (i32, i32) {
    %c0_i32 = arith.constant 0 : i32
    %c0_i32_0 = arith.constant 0 : i32
    %c0_i32_1 = arith.constant 0 : i32
    return %c0_i32, %c0_i32_0 : i32, i32
  }
  func.func @transform_22(%arg0: i32, %arg1: i32) -> (i32, i32, i32) {
    %c0_i32 = arith.constant 0 : i32
    %c0_i32_0 = arith.constant 0 : i32
    %c0_i32_1 = arith.constant 0 : i32
    return %arg0, %c0_i32, %c0_i32_0 : i32, i32, i32
  }
}

</mosaic_0001>

<bundles_post_ra>
// kernel: mm_encoder_forward.1
= control target key start
LH: loop header
LB: loop body
LE: loop exit
PB: predicated region body
PF: predicated region fallthrough
CT: control target
= control target key end

     0   :  { %s6169_s0 = inlined_call_operand.vmem [shape: bf16[2,4,768], index: 0, kind: input, shape index: {}]   ;;  %s6170_s1 = inlined_call_operand.hbm [shape: bf16[768,128], index: 1, kind: input, shape index: {}]   ;;  %s6171_s2 = inlined_call_operand.vmem [shape: f32[1,128], index: 2, kind: input, shape index: {}]   ;;  %s6172_s3 = inlined_call_operand.vmem [shape: f32[8,128], index: 3, kind: input, shape index: {}]   ;;  %s6173_s4 = inlined_call_operand.vmem [shape: f32[1,8], index: 4, kind: input, shape index: {}]   ;;  %s6174_s5 = inlined_call_operand.vmem [shape: f32[1,128], index: 5, kind: input, shape index: {}]   ;;  %s6175_s6 = inlined_call_operand.vmem [shape: f32[1,128], index: 6, kind: input, shape index: {}]   ;;  %s6176_s7 = inlined_call_operand.vmem [shape: f32[2,1,128], index: 7, kind: input, shape index: {}]   ;;  %s6177_s8 = inlined_call_operand.hbm [shape: f32[2,1,128], index: 8, kind: input, shape index: {}]   ;;  %s6178_s9 = inlined_call_operand.hbm [shape: bf16[2,128,384], index: 9, kind: input, shape index: {}]   ;;  %s6179_s10 = inlined_call_operand.vmem [shape: f32[2,1,384], index: 10, kind: input, shape index: {}]   ;;  %s6180_s11 = inlined_call_operand.vmem [shape: bf16[2,128,128], index: 11, kind: input, shape index: {}]   ;;  %s6181_s12 = inlined_call_operand.hbm [shape: f32[2,1,128], index: 12, kind: input, shape index: {}]   ;;  %s6182_s13 = inlined_call_operand.hbm [shape: f32[2,1,128], index: 13, kind: input, shape index: {}]   ;;  %s6183_s14 = inlined_call_operand.hbm [shape: f32[2,1,128], index: 14, kind: input, shape index: {}]   ;;  %s6184_s15 = inlined_call_operand.vmem [shape: bf16[2,128,512], index: 15, kind: input, shape index: {}]   ;;  %s6185_s16 = inlined_call_operand.vmem [shape: f32[2,1,512], index: 16, kind: input, shape index: {}]   ;;  %s6186_s17 = inlined_call_operand.vmem [shape: bf16[2,512,128], index: 17, kind: input, shape index: {}]   ;;  %s6187_s18 = inlined_call_operand.vmem [shape: f32[2,1,128], index: 18, kind: input, shape index: {}]   ;;  %s6188_s19 = inlined_call_operand.vmem [shape: f32[1,128], index: 19, kind: input, shape index: {}]   ;;  %s6189_s20 = inlined_call_operand.vmem [shape: f32[1,128], index: 20, kind: input, shape index: {}]   ;;  %s6190_s21 = inlined_call_operand.hbm [shape: bf16[128,128], index: 21, kind: input, shape index: {}]   ;;  %s6191_s22 = inlined_call_operand.hbm [shape: f32[2,1,128], index: 22, kind: output, shape index: {}]  }
   0x1   :  { %6212 = sst [smem:[#allocation35_spill]] %s6169_s0 }
   0x2   :  { %6213 = sst [smem:[#allocation36_spill]] %s6170_s1 }
   0x3   :  { %6214 = sst [smem:[#allocation37_spill]] %s6171_s2 }
   0x4   :  { %6215 = sst [smem:[#allocation38_spill]] %s6172_s3 }
   0x5   :  { %6216 = sst [smem:[#allocation39_spill]] %s6173_s4 }
   0x6   :  { %6217 = sst [smem:[#allocation40_spill]] %s6174_s5 }
   0x7   :  { %6218 = sst [smem:[#allocation41_spill]] %s6175_s6 }
   0x8   :  { %6219 = sst [smem:[#allocation42_spill]] %s6176_s7 }
   0x9   :  { %6220 = sst [smem:[#allocation43_spill]] %s6177_s8 }
   0xa   :  { %6221 = sst [smem:[#allocation44_spill]] %s6178_s9 }
   0xb   :  { %6222 = sst [smem:[#allocation45_spill]] %s6179_s10 }
   0xc   :  { %6223 = sst [smem:[#allocation46_spill]] %s6180_s11 }
   0xd   :  { %6224 = sst [smem:[#allocation47_spill]] %s6181_s12 }
   0xe   :  { %6225 = sst [smem:[#allocation48_spill]] %s6182_s13 }
   0xf   :  { %6226 = sst [smem:[#allocation49_spill]] %s6184_s15 }
  0x10   :  { %6227 = sst [smem:[#allocation50_spill]] %s6185_s16 }
  0x11   :  { %6228 = sst [smem:[#allocation51_spill]] %s6186_s17 }
  0x12   :  { %6229 = sst [smem:[#allocation52_spill]] %s6187_s18 }
  0x13   :  { %6230 = sst [smem:[#allocation53_spill]] %s6188_s19 }
  0x14   :  { %6231 = sst [smem:[#allocation54_spill]] %s6189_s20 }
  0x15   :  { %6232 = sst [smem:[#allocation55_spill]] %s6190_s21 }
  0x16   :  { %6233 = sst [smem:[#allocation56_spill]] %s6191_s22 }
  0x17   :  { %27 = vsyncpa [#allocation4], 0 }
  0x18   :  { %28 = vsyncpa [#allocation7], 0 }
  0x19   :  { %30 = vsyncpa [#allocation7 + $0x1], 0 }
  0x1a   :  { %31 = vsyncpa [#allocation10], 0 }
  0x1b   :  { %33 = vsyncpa [#allocation10 + $0x1], 0 }
  0x1c   :  { %34 = vsyncpa [#allocation13], 0 }
  0x1d   :  { %36 = vsyncpa [#allocation13 + $0x1], 0 }
  0x1e   :  { %37 = vsyncpa [#allocation5], 0 }
  0x1f   :  { %39 = vsyncpa [#allocation5 + $0x1], 0  ;;  %s5459_s3 = smov 0   ;;  %s5461_s28 = smov 0  }
  0x20   :  { %s5463_s29 = smov 0   ;;  %s5465_s30 = smov 0  }
  0x21   :  { %s5467_s4 = smov 0   ;;  %s5469_s0 = smov 0  }
  0x22   :  { %s5471_s23 = smov 0   ;;  %s5473_s1 = smov 0  }
  0x23   :  { %s5475_s5 = smov 0   ;;  %s5477_s24 = smov 0  }
  0x24   :  { %s5479_s6 = smov 0  }
  0x25 LB: > { %6234 = sst [smem:[#allocation22_spill]] %s5278_s3  ;;  %s5513_s25 = sadd.s32 4294967295, %s5318_s6   ;;  %s5318_s6 = sphi %s5479_s6, %s45_s6   ;;  %s5314_s24 = sphi %s5477_s24, %s6309_s24   ;;  %s5310_s5 = sphi %s5475_s5, %s6308_s5   ;;  %s5306_s1 = sphi %s5473_s1, %s6307_s1   ;;  %s5302_s23 = sphi %s5471_s23, %s6306_s23   ;;  %s5298_s0 = sphi %s5469_s0, %s6305_s0   ;;  %s5294_s4 = sphi %s5467_s4, %s6313_s4   ;;  %s5290_s30 = sphi %s5465_s30, %s6312_s30   ;;  %s5286_s29 = sphi %s5463_s29, %s6303_s29   ;;  %s5282_s28 = sphi %s5461_s28, %s6311_s28   ;;  %s5278_s3 = sphi %s5459_s3, %s6310_s3  }
  0x26   : > { %6235 = sst [smem:[#allocation23_spill]] %s5286_s29  ;;  %s4136_s26 = sadd.s32 4294967294, %s5318_s6  }
  0x27   : > { %6236 = sst [smem:[#allocation24_spill]] %s5298_s0  ;;  %p255_p0 = scmp.ne.s32.totalorder %s5294_s4, %s5290_s30 }
  0x28   : > { %6237 = sst [smem:[#allocation25_spill]] %s5302_s23  ;;  %p6203_p1 = scmp.eq.s32.totalorder %s5513_s25, 0 }
  0x29   : > { %6238 = sst [smem:[#allocation26_spill]] %s5310_s5  ;;  %p601_p2 = scmp.ne.s32.totalorder %s5286_s29, %s5282_s28 }
  0x2a   : > { %6239 = sst [smem:[#allocation27_spill]] %s5314_s24  ;;  %p5523_p3 = por %p6203_p1, %p255_p0 }
  0x2b   : > { %6240 = sst [smem:[#allocation28_spill]] %s5318_s6  ;;  %p602_p4 = scmp.eq.s32.totalorder %s5513_s25, 3 }
  0x2c   : > { %p607_p5 = scmp.ne.s32.totalorder %s5282_s28, %s5278_s3  ;;  %p608_p6 = scmp.eq.s32.totalorder %s4136_s26, 3 }
  0x2d   : > { %p5530_p7 = por %p602_p4, %p601_p2  ;;  %p4137_p8 = scmp.ge.s32.totalorder %s5318_s6, 1 }
  0x2e   : > { %p5535_p9 = por %p608_p6, %p607_p5  ;;  %p615_p10 = scmp.lt.s32.totalorder %s5318_s6, 5 }
  0x2f   : > { %s6242_s22 = scalar_select %p5530_p7, 1, 0 }
  0x30   : > { %s6244_s20 = scalar_select %p5535_p9, 1, 0 }
  0x31   : > { %6243 = sst [smem:[#allocation29_spill]] %s6242_s22  ;;  %p5540_p11 = pnand %p4137_p8, %p615_p10 }
  0x32   : > { %6245 = sst [smem:[#allocation30_spill]] %s6244_s20  ;;  %s5320_s2 = smov [#allocation14]  }
  0x33   : > { %p4633_p12 = pneg %p5540_p11  ;;  %s661_s3 = sshll.u32 %s5320_s2, 4  ;;  %s662_s3 = int_to_ptr.vmem [resolvable:$true] %s661_s3 }
  0x34   : > { %s5001_s20 = scalar_lea.vmem %s662_s3, 1024  ;;  %p5009_p6 = scmp.lt.s32.totalorder %s662_s3, %s662_s3 }
  0x35   : > { %p5548_p13 = pnand %p4633_p12, %p6203_p1  ;;  %p5002_p2 = scmp.ne.s32.totalorder %s662_s3, %s5001_s20 }
  0x36   : > { %p5010_p8 = scmp.lt.s32.totalorder %s5001_s20, %s5001_s20 }
  0x37   : > { %p4992_p0 = pneg %p5548_p13 }
  0x38   : > { %p5011_p10 = por %p5010_p8, %p5009_p6 }
  0x39   : > { %p5004_p4 = pnand %p5002_p2, %p4992_p0 }
  0x3b   : > { %p5005_p5 = pneg %p5004_p4 }
  0x3d   : > { %p5012_p9 = pnand %p5011_p10, %p5005_p5 }
  0x3f   : > { %5015 = shalt.err (!%p5012_p9)
}
  0x40   : > { %s6198_s2 = smov 64   ;;  %s6199_s22 = smov 4  }
  0x41   : > { %s6248_s21 = sld [smem:[#allocation55_spill]]  ;;  %s54_s18 = sadd.s32 1, %s5310_s5 }
  0x42   : > { %p55_p9 = scmp.ge.s32.totalorder %s54_s18, 2  ;;  %s57_s17 = sadd.s32 1, %s5314_s24 }
  0x43   : > { %s242_s16 = sadd.s32 1, %s5298_s0  ;;  %p249_p12 = scmp.ne.s32.totalorder %s5298_s0, %s5294_s4 }
  0x44   : > { %s6315_s18 = smov (%p55_p9, %s54_s18), 0  ;;  %s6317_s17 = smov (!%p55_p9, %s57_s17), %s5314_s24 }
  0x45   : > { %6249 = sst [smem:[#allocation31_spill]] %s6315_s18  ;;  %s239_s15 = ssub.s32 %s5310_s5, %s6315_s18 }
  0x46   : > { %p250_p2 = scmp.eq.s32.totalorder %s5318_s6, 0  ;;  %p59_p4 = scmp.ge.s32.totalorder %s6317_s17, 2 }
  0x47   : > { %4639 = dma.hbm_to_vmem [thread:$0]  (!%p5548_p13), %s6248_s21, 1024, %s662_s3, [#allocation13], %s6198_s2, %s6198_s2, %s6199_s22  }
  0x48   : > { %p240_p5 = scmp.eq.s32.totalorder %s239_s15, 0  ;;  %p5576_p6 = por %p250_p2, %p249_p12 }
  0x49   : > { %p4662_p8 = scmp.lt.s32.totalorder %s5318_s6, 4  ;;  %s6319_s17 = smov (%p59_p4, %s6317_s17), 0 }
  0x4a   : > { %6251 = sst [smem:[#allocation32_spill]] %s6319_s17  ;;  %s588_s20 = ssub.s32 %s5314_s24, %s6319_s17 }
  0x4b   : > { %s5584_s3 = scalar_select %p240_p5, %s5298_s0, %s242_s16  }
  0x4c   : > { %s5589_s2 = sand.u32 1, %s5318_s6   ;;  %p589_p10 = scmp.eq.s32.totalorder %s588_s20, 0 }
  0x4d   : > { %6252 = sst [smem:[#allocation33_spill]] %s5584_s3  ;;  %s5592_s22 = sand.u32 1, %s5298_s0  }
  0x4e   : > { %s5595_s15 = sshll.u32 %s5310_s5, 4  ;;  %s6253_s21 = sadd.s32 1, %s5286_s29 }
  0x4f   : > { %s5600_s18 = scalar_select %p589_p10, %s5286_s29, %s6253_s21  }
  0x50   : > { %s6255_s8 = sld [smem:[#allocation43_spill]]  ;;  %s692_s16 = scalar_lea.vmem [#allocation6], %s5592_s22 }
  0x51   : > { %6254 = sst [smem:[#allocation34_spill]] %s5600_s18  ;;  %s699_s3 = sshll.u32 %s692_s16, 4  ;;  %s700_s3 = int_to_ptr.vmem [resolvable:$true] %s699_s3 }
  0x52   : > { %p5609_p9 = pnand %p4662_p8, %p5576_p6  ;;  %s6209_s20 = scalar_lea.sflag [#allocation7], %s5589_s2 }
  0x53   : > { %s5029_s21 = scalar_lea.vmem %s700_s3, 16  ;;  %s5323_s10 = smov [#allocation6]  }
  0x54   : > { %p5616_p12 = pneg %p5609_p9  ;;  %p5030_p2 = scmp.ne.s32.totalorder %s700_s3, %s5029_s21 }
  0x55   : > { %s5034_s11 = sshll.u32 %s5323_s10, 4  ;;  %s5035_s11 = int_to_ptr.vmem [resolvable:$false] %s5034_s11 }
  0x56   : > { %s697_s7 = scalar_lea.hbm %s6255_s8, %s5595_s15  ;;  %p5032_p4 = pnand %p5030_p2, %p5616_p12 }
  0x57   : > { %s5036_s19 = scalar_lea.vmem %s5035_s11, 32  ;;  %p5037_p6 = scmp.lt.s32.totalorder %s700_s3, %s5035_s11 }
  0x58   : > { %p5033_p5 = pneg %p5032_p4  ;;  %p5038_p8 = scmp.lt.s32.totalorder %s5036_s19, %s5029_s21 }
  0x5a   : > { %p5039_p10 = por %p5038_p8, %p5037_p6 }
  0x5c   : > { %p5040_p1 = pnand %p5039_p10, %p5033_p5 }
  0x5e   : > { %5043 = shalt.err (!%p5040_p1)
}
  0x5f   : > { %4643 = dma.hbm_to_vmem [thread:$0]  (!%p5609_p9), %s697_s7, 16, %s700_s3, %s6209_s20  }
  0x60   : > { %s6258_s12 = sld [smem:[#allocation47_spill]]  ;;  %s745_s0 = scalar_lea.vmem [#allocation9], %s5592_s22 }
  0x61   : > { %s752_s18 = sshll.u32 %s745_s0, 4  ;;  %s6208_s21 = scalar_lea.sflag [#allocation10], %s5589_s2  ;;  %s753_s18 = int_to_ptr.vmem [resolvable:$true] %s752_s18 }
  0x62   : > { %s5057_s11 = scalar_lea.vmem %s753_s18, 16  ;;  %s5324_s19 = smov [#allocation9]  }
  0x63   : > { %p5058_p2 = scmp.ne.s32.totalorder %s753_s18, %s5057_s11  ;;  %s5062_s29 = sshll.u32 %s5324_s19, 4  ;;  %s5063_s29 = int_to_ptr.vmem [resolvable:$false] %s5062_s29 }
  0x64   : > { %s5064_s6 = scalar_lea.vmem %s5063_s29, 32  ;;  %p5065_p5 = scmp.lt.s32.totalorder %s753_s18, %s5063_s29 }
  0x65   : > { %p5060_p1 = pnand %p5058_p2, %p5616_p12  ;;  %p5066_p6 = scmp.lt.s32.totalorder %s5064_s6, %s5057_s11 }
  0x66   : > { %s750_s10 = scalar_lea.hbm %s6258_s12, %s5595_s15 }
  0x67   : > { %p5061_p4 = pneg %p5060_p1  ;;  %p5067_p8 = por %p5066_p6, %p5065_p5 }
  0x69   : > { %p5068_p10 = pnand %p5067_p8, %p5061_p4 }
  0x6b   : > { %5071 = shalt.err (!%p5068_p10)
}
  0x6c   : > { %4649 = dma.hbm_to_vmem [thread:$0]  (!%p5609_p9), %s750_s10, 16, %s753_s18, %s6208_s21  }
  0x6d   : > { %s5325_s7 = smov [#allocation3]   ;;  %s4608_s0 = smul.u32 192, %s5592_s22 }
  0x6e   : > { %s627_s8 = sshll.u32 %s5325_s7, 4  ;;  %s4609_s3 = smul.u32 3072, %s5310_s5  ;;  %s628_s8 = int_to_ptr.vmem [resolvable:$true] %s627_s8 }
  0x6f   : > { %s5083_s16 = scalar_lea.vmem %s628_s8, 6144  ;;  %p5091_p5 = scmp.lt.s32.totalorder %s628_s8, %s628_s8 }
  0x70   : > { %p5084_p2 = scmp.ne.s32.totalorder %s628_s8, %s5083_s16  ;;  %p5092_p6 = scmp.lt.s32.totalorder %s5083_s16, %s5083_s16 }
  0x72   : > { %p5086_p1 = pnand %p5084_p2, %p4992_p0  ;;  %p5093_p8 = por %p5092_p6, %p5091_p5 }
  0x74   : > { %p5087_p4 = pneg %p5086_p1 }
  0x76   : > { %p5094_p10 = pnand %p5093_p8, %p5087_p4 }
  0x78   : > { %5097 = shalt.err (!%p5094_p10)
}
  0x79   : > { %s6259_s29 = smov 4   ;;  %s6260_s18 = smov 64  }
  0x7a   : > { %s6261_s11 = sld [smem:[#allocation36_spill]]  ;;  %s710_s20 = scalar_lea.vmem [#allocation8], %s4608_s0 }
  0x7b   : > { %s6262_s9 = sld [smem:[#allocation44_spill]]  ;;  %s717_s12 = sshll.u32 %s710_s20, 4  ;;  %s718_s12 = int_to_ptr.vmem [resolvable:$true] %s717_s12 }
  0x7c   : > { %s5111_s16 = scalar_lea.vmem %s718_s12, 3072  ;;  %s5326_s26 = smov [#allocation8]  }
  0x7d   : > { %p5112_p0 = scmp.ne.s32.totalorder %s718_s12, %s5111_s16  ;;  %s5116_s5 = sshll.u32 %s5326_s26, 4  ;;  %s5117_s5 = int_to_ptr.vmem [resolvable:$false] %s5116_s5 }
  0x7e   : > { %s5118_s23 = scalar_lea.vmem %s5117_s5, 6144  ;;  %p5119_p4 = scmp.lt.s32.totalorder %s718_s12, %s5117_s5 }
  0x7f   : > { %p5114_p2 = pnand %p5112_p0, %p5616_p12  ;;  %p5120_p5 = scmp.lt.s32.totalorder %s5118_s23, %s5111_s16 }
  0x80   : > { %4636 = dma.hbm_to_vmem [thread:$0]  (!%p5548_p13), %s6261_s11, 6144, %s628_s8, [#allocation4], %s6260_s18, %s6260_s18, %s6259_s29  }
  0x81   : > { %s716_s21 = scalar_lea.hbm %s6262_s9, %s4609_s3  ;;  %p5115_p1 = pneg %p5114_p2 }
  0x82   : > { %p5121_p6 = por %p5120_p5, %p5119_p4 }
  0x84   : > { %p5122_p13 = pnand %p5121_p6, %p5115_p1 }
  0x86   : > { %5125 = shalt.err (!%p5122_p13)
}
  0x87   : > { %s5327_s8 = smov 192   ;;  %s5328_s20 = smov 12  }
  0x88   : > { %s6263_s0 = scalar_lea.sflag [#allocation7], %s5589_s2  ;;  %s6264_s13 = sld [smem:[#allocation48_spill]] }
  0x89   : > { %4646 = dma.hbm_to_vmem [thread:$0]  (!%p5609_p9), %s716_s21, 3072, %s718_s12, %s6263_s0, %s5327_s8, %s5327_s8, %s5328_s20  }
  0x8a   : > { %s762_s6 = scalar_lea.vmem [#allocation11], %s5592_s22  ;;  %s5329_s10 = smov [#allocation11]  }
  0x8b   : > { %s769_s5 = sshll.u32 %s762_s6, 4  ;;  %s5144_s11 = sshll.u32 %s5329_s10, 4  ;;  %s770_s5 = int_to_ptr.vmem [resolvable:$true] %s769_s5  ;;  %s5145_s11 = int_to_ptr.vmem [resolvable:$false] %s5144_s11 }
  0x8c   : > { %s5139_s23 = scalar_lea.vmem %s770_s5, 16  ;;  %s5146_s19 = scalar_lea.vmem %s5145_s11, 32 }
  0x8d   : > { %p5140_p8 = scmp.ne.s32.totalorder %s770_s5, %s5139_s23  ;;  %p5147_p2 = scmp.lt.s32.totalorder %s770_s5, %s5145_s11 }
  0x8e   : > { %s767_s18 = scalar_lea.hbm %s6264_s13, %s5595_s15  ;;  %p5148_p1 = scmp.lt.s32.totalorder %s5146_s19, %s5139_s23 }
  0x8f   : > { %p5142_p10 = pnand %p5140_p8, %p5616_p12 }
  0x90   : > { %p5149_p4 = por %p5148_p1, %p5147_p2 }
  0x91   : > { %p5143_p0 = pneg %p5142_p10 }
  0x93   : > { %p5150_p5 = pnand %p5149_p4, %p5143_p0 }
  0x95   : > { %5153 = shalt.err (!%p5150_p5)
}
  0x96   : > { %s6265_s12 = scalar_lea.sflag [#allocation10], %s5589_s2  ;;  %s784_s16 = scalar_lea.hbm %s6183_s14, %s5595_s15 }
  0x97   : > { %4652 = dma.hbm_to_vmem [thread:$0]  (!%p5609_p9), %s767_s18, 16, %s770_s5, %s6265_s12  }
  0x98   : > { %s779_s26 = scalar_lea.vmem [#allocation12], %s5592_s22  ;;  %s777_s20 = scalar_lea.sflag [#allocation13], %s5589_s2 }
  0x99   : > { %s786_s8 = sshll.u32 %s779_s26, 4  ;;  %s5330_s3 = smov [#allocation12]   ;;  %s787_s8 = int_to_ptr.vmem [resolvable:$true] %s786_s8 }
  0x9a   : > { %s5167_s0 = scalar_lea.vmem %s787_s8, 16  ;;  %s5172_s29 = sshll.u32 %s5330_s3, 4  ;;  %s5173_s29 = int_to_ptr.vmem [resolvable:$false] %s5172_s29 }
  0x9b   : > { %p5168_p6 = scmp.ne.s32.totalorder %s787_s8, %s5167_s0  ;;  %s5174_s6 = scalar_lea.vmem %s5173_s29, 32 }
  0x9c   : > { %p5175_p10 = scmp.lt.s32.totalorder %s787_s8, %s5173_s29  ;;  %p5176_p0 = scmp.lt.s32.totalorder %s5174_s6, %s5167_s0 }
  0x9d   : > { %p5170_p13 = pnand %p5168_p6, %p5616_p12 }
  0x9e   : > { %p5177_p2 = por %p5176_p0, %p5175_p10 }
  0x9f   : > { %p5171_p8 = pneg %p5170_p13 }
  0xa1   : > { %p5178_p1 = pnand %p5177_p2, %p5171_p8 }
  0xa3   : > { %5181 = shalt.err (!%p5178_p1)
}
  0xa4   : > { %4655 = dma.hbm_to_vmem [thread:$0]  (!%p5609_p9), %s784_s16, 16, %s787_s8, %s777_s20  }
  0xa5   : > { %824 = sbr.rel (%p5540_p11) target bundleno = 3833 (0xef9), region = 108  ;;  %p6266_p4 = scmp.eq.s32.totalorder (!%p5540_p11), %s5513_s25, 0 }
  0xaa   : > { %5253 = dma.done.wait (%p6266_p4), [#allocation4], 6144   ;;  %p6267_p12 = pmov %p6266_p4 }
  0xab   : > { %s830_s22 = sand.u32 1, %s5513_s25   ;;  %s5689_s24 = sand.u32 1, %s5294_s4  }
  0xac   : > { %5255 = vsyncadd (%p6267_p12), [#allocation4], 4294961152  ;;  %s831_s2 = scalar_lea.sflag [#allocation7], %s830_s22 }
  0xad   : > { %5257 = dma.done.wait (%p5523_p3), %s831_s2, 3088  }
  0xae   : > { %5259 = vsyncadd (%p5523_p3), %s831_s2, 4294964208  ;;  %s4610_s17 = smul.u32 192, %s5689_s24  ;;  %s848_s18 = scalar_lea.sflag [#allocation10], %s830_s22 }
  0xb0   : > { %s5697_s30 = scalar_lea.vmem [#allocation8], %s4610_s17 }
  0xb1   : > { %5261 = dma.done.wait (%p5523_p3), %s848_s18, 32  }
  0xb2   : > { %5263 = vsyncadd (%p5523_p3), %s848_s18, 4294967264  ;;  %s864_s10 = scalar_lea.sflag [#allocation13], %s830_s22 }
  0xb3   : > { %5265 = dma.done.wait (%p5523_p3), %s864_s10, 16  }
  0xb4   : > { %5267 = vsyncadd (%p5523_p3), %s864_s10, 4294967280  ;;  %p6268_p11 = pmov %p6266_p4 }
  0xb5   : > { %p6269_p9 = pmov %p6266_p4 }
  0xb6   : > { %5269 = dma.done.wait (%p6268_p11), [#allocation13], 1024  }
  0xb7   : > { %5271 = vsyncadd (%p6269_p9), [#allocation13], 4294966272  ;;  %s6270_s19 = sld [smem:[#allocation25_spill]]  ;;  %p980_p5 = scmp.lt.s32.totalorder %s5306_s1, 1 }
  0xb8   : > { %s6272_s29 = sld [smem:[#allocation35_spill]]  ;;  %s6279_s9 = sand.u32 1, %s5282_s28  }
  0xb9   : > { %s981_s21 = scalar_select %p980_p5, %s5306_s1, 1 }
  0xba   : > { %s6273_s18 = sld [smem:[#allocation45_spill]]  ;;  %s5765_s13 = scalar_lea.vmem [#allocation15], %s6279_s9 }
  0xbb   : > { %s4611_s25 = smul.u32 12, %s981_s21  ;;  %s6274_s5 = sld [smem:[#allocation46_spill]] }
  0xbc   : > { %s6275_s8 = sld [smem:[#allocation49_spill]] }
  0xbd   : > { %p985_p6 = scmp.lt.s32.totalorder %s6270_s19, 1  ;;  %s6276_s3 = sld [smem:[#allocation50_spill]] }
  0xbe   : > { %s5729_s6 = scalar_lea.vmem %s6272_s29, %s4611_s25  ;;  %s6277_s17 = sld [smem:[#allocation51_spill]] }
  0xbf   : > { %s5719_s7 = scalar_select %p985_p6, %s6270_s19, 1 }
  0xc0   : > { %s6278_s11 = sld [smem:[#allocation52_spill]]  ;;  %p4157_p3 = scmp.ne.s32.totalorder %s6270_s19, 0 }
  0xc1   : > { %s4612_s20 = smul.u32 3, %s5719_s7  ;;  %s4344_s22 = sshll.u32 %s5719_s7, 6 }
  0xc2   : > { %s5740_s21 = scalar_lea.vmem %s6274_s5, %s4344_s22  ;;  %s4345_s15 = sshll.u32 %s5719_s7, 8 }
  0xc3   : > { %s5735_s10 = scalar_lea.vmem %s6273_s18, %s4612_s20  ;;  %s4154_s27 = sshll.u32 %s5719_s7, 2 }
  0xc4   : > { %s5747_s12 = scalar_lea.vmem %s6275_s8, %s4345_s15  ;;  %s5752_s29 = scalar_lea.vmem %s6276_s3, %s4154_s27 }
  0xc5   : > { %s5757_s18 = scalar_lea.vmem %s6277_s17, %s4345_s15  ;;  %1018 = sbr.rel (%p4157_p3) target bundleno = 781 (0x30d), region = 140 }
  0xc6   : > { %s1013_s22 = scalar_lea.vmem %s6278_s11, %s5719_s7  ;;  %s6280_s19 = sld [smem:[#allocation37_spill]] (!%p4157_p3) }
  0xc7   : > { %s6281_s27 = sld [smem:[#allocation38_spill]] (!%p4157_p3) }
  0xc8   : > { %s6282_s3 = sld [smem:[#allocation40_spill]] (!%p4157_p3) }
  0xc9   : > { %s6283_s17 = sld [smem:[#allocation41_spill]] (!%p4157_p3) }
  0xca   : > { %v4772_v0 = vld [vmem:[#allocation3 + $0x78] sm:$0xff]   ;;  %v4776_v4 = vld [vmem:[#allocation3 + $0x70] sm:$0xff]   ;;  %v4780_v8 = vld [vmem:[#allocation3 + $0x68] sm:$0xff]   ;;  %v1128_v27 = vlaneseq  ;;  %v5331_v35 = vmov 1983009808  }
  0xcb   : > { %v4773_v1 = vld [vmem:[#allocation3 + $0x38] sm:$0xff]   ;;  %4347 = vmatprep.subr.bf16.mxu0 %v4772_v0  ;;  %v4777_v5 = vld [vmem:[#allocation3 + $0x30] sm:$0xff]   ;;  %v4781_v9 = vld [vmem:[#allocation3 + $0x28] sm:$0xff]   ;;  %v1126_v36 = vunpack.c.l.s4 %v5331_v35 }
  0xcc   : > { %v4774_v2 = vld [vmem:[#allocation3 + $0xf8] sm:$0xff]   ;;  %4348 = vmatpush3.bf16.msra.mxu0 %v4773_v1  ;;  %v4778_v6 = vld [vmem:[#allocation3 + $0xf0] sm:$0xff]   ;;  %v4782_v10 = vld [vmem:[#allocation3 + $0xe8] sm:$0xff]   ;;  %v1129_v32 = vshrl.u32 %v1128_v27, 7  ;;  %v5332_v1 = vmov 0.0  }
  0xcd   : > { %v4775_v3 = vld [vmem:[#allocation3 + $0xb8] sm:$0xff]   ;;  %4369 = vmatprep.subr.bf16.mxu1 %v4774_v2  ;;  %4349 = vmatprep.subr.bf16.mxu0 %v4776_v4  ;;  %v4779_v7 = vld [vmem:[#allocation3 + $0xb0] sm:$0xff]   ;;  %v4783_v11 = vld [vmem:[#allocation3 + $0xa8] sm:$0xff]   ;;  %v1127_v38 = vunpack.c.0.s8 %v1126_v36  ;;  %1564 = vst [vmem:[#allocation2 + $0x5] sm:$0x7] %v5332_v1 }
  0xce   : > { %4370 = vmatpush3.bf16.msra.mxu1 %v4775_v3  ;;  %v4784_v12 = vld [vmem:[#allocation3 + $0x60] sm:$0xff]   ;;  %v4788_v16 = vld [vmem:[#allocation3 + $0x58] sm:$0xff]   ;;  %v4792_v20 = vld [vmem:[#allocation3 + $0x50] sm:$0xff]  }
  0xcf   : > { %4371 = vmatprep.subr.bf16.mxu1 %v4778_v6  ;;  %v4785_v13 = vld [vmem:[#allocation3 + $0x20] sm:$0xff]   ;;  %v4789_v17 = vld [vmem:[#allocation3 + $0x18] sm:$0xff]   ;;  %v4793_v21 = vld [vmem:[#allocation3 + $0x10] sm:$0xff]   ;;  %v1130_v40 = vsub.s32 %v1127_v38, %v1129_v32 }
  0xd0   : > { %4350 = vmatpush3.bf16.msra.mxu0 %v4777_v5  ;;  %v4786_v14 = vld [vmem:[#allocation3 + $0xe0] sm:$0xff]   ;;  %v4790_v18 = vld [vmem:[#allocation3 + $0xd8] sm:$0xff]   ;;  %v4794_v22 = vld [vmem:[#allocation3 + $0xd0] sm:$0xff]  }
  0xd1   : > { %4351 = vmatprep.subr.bf16.mxu0 %v4780_v8  ;;  %v4787_v15 = vld [vmem:[#allocation3 + $0xa0] sm:$0xff]   ;;  %v4791_v19 = vld [vmem:[#allocation3 + $0x98] sm:$0xff]   ;;  %v4795_v23 = vld [vmem:[#allocation3 + $0x90] sm:$0xff]  }
  0xd2   : > { %4372 = vmatpush3.bf16.msra.mxu1 %v4779_v7  ;;  %v4796_v24 = vld [vmem:[#allocation3 + $0x48] sm:$0xff]   ;;  %v4800_v29 = vld [vmem:[#allocation3 + $0x40] sm:$0xff]   ;;  %v1019_v33 = vld [vmem:[%s5729_s6] sm:$0xff] }
  0xd3   : > { %4373 = vmatprep.subr.bf16.mxu1 %v4782_v10  ;;  %v4797_v25 = vld [vmem:[#allocation3 + $0x8] sm:$0xff]   ;;  %v4801_v30 = vld [vmem:[#allocation3] sm:$0xff]   ;;  %v4804_v37 = vld [vmem:[#allocation3 + $0x178] sm:$0xff]   ;;  %v1124_v39 = vcombine.high %v1019_v33, %v1019_v33  ;;  %v1131_v41 = vrot.slane %v1019_v33, %v1130_v40 }
  0xd4   : > { %4352 = vmatpush3.bf16.msra.mxu0 %v4781_v9  ;;  %v4798_v26 = vld [vmem:[#allocation3 + $0xc8] sm:$0xff]   ;;  %v4802_v31 = vld [vmem:[#allocation3 + $0xc0] sm:$0xff]   ;;  %v4806_v45 = vld [vmem:[#allocation3 + $0x138] sm:$0xff]  }
  0xd5   : > { %4353 = vmatprep.subr.bf16.mxu0 %v4784_v12  ;;  %v4799_v28 = vld [vmem:[#allocation3 + $0x88] sm:$0xff]   ;;  %v4803_v34 = vld [vmem:[#allocation3 + $0x80] sm:$0xff]   ;;  %v1138_v42 = vrot.slane %v1124_v39, %v1130_v40  ;;  %v1139_v43 = vcombine.high %v1131_v41, %v1131_v41  ;;  %v4807_v46 = vld [vmem:[#allocation3 + $0x170] sm:$0xff]  }
  0xd6   : > { %4374 = vmatpush3.bf16.msra.mxu1 %v4783_v11  ;;  %v4808_v47 = vld [vmem:[#allocation3 + $0x130] sm:$0xff]   ;;  %v4809_v48 = vld [vmem:[#allocation3 + $0x168] sm:$0xff]   ;;  %v4158_v50 = vld.sshfl [vmem:[%s5729_s6 + $0x8] sm:$0x33 pattern:$0x76325410] }
  0xd7   : > { %4375 = vmatprep.subr.bf16.mxu1 %v4786_v14  ;;  %v1140_v44 = vcombine.high %v1138_v42, %v1138_v42  ;;  %1475 = vmatprep.mubr.bf16.mxu0 %v1139_v43  ;;  %v4810_v49 = vld [vmem:[#allocation3 + $0x128] sm:$0xff]   ;;  %v4811_v51 = vld [vmem:[#allocation3 + $0x160] sm:$0xff]   ;;  %v1148_v52 = vcombine.high %v4158_v50, %v4158_v50  ;;  %v4813_v54 = vld [vmem:[#allocation3 + $0x158] sm:$0xff]  }
  0xd8   : > { %4354 = vmatpush3.bf16.msra.mxu0 %v4785_v13  ;;  %v4812_v53 = vld [vmem:[#allocation3 + $0x120] sm:$0xff]   ;;  %v4814_v55 = vld [vmem:[#allocation3 + $0x118] sm:$0xff]   ;;  %v4815_v56 = vld [vmem:[#allocation3 + $0x150] sm:$0xff]  }
  0xd9   : > { %4355 = vmatprep.subr.bf16.mxu0 %v4788_v16  ;;  %1515 = vmatprep.mubr.bf16.mxu1 %v1140_v44  ;;  %v4816_v57 = vld [vmem:[#allocation3 + $0x110] sm:$0xff]   ;;  %v4817_v58 = vld [vmem:[#allocation3 + $0x148] sm:$0xff]   ;;  %v4819_v60 = vld [vmem:[#allocation3 + $0x140] sm:$0xff]  }
  0xda   : > { %4376 = vmatpush3.bf16.msra.mxu1 %v4787_v15  ;;  %v4818_v59 = vld [vmem:[#allocation3 + $0x108] sm:$0xff]   ;;  %v4820_v61 = vld [vmem:[#allocation3 + $0x100] sm:$0xff]   ;;  %v1117_v62 = vld [vmem:[%s6280_s19] sm:$0x1] }
  0xdb   : > { %4377 = vmatprep.subr.bf16.mxu1 %v4790_v18  ;;  %v1118_v63 = vld [vmem:[%s6281_s27] sm:$0x1]  ;;  %v1121_v11 = vld [vmem:[%s6281_s27 + $0x1] sm:$0xf] }
  0xdc   : > { %4356 = vmatpush3.bf16.msra.mxu0 %v4789_v17  ;;  %v1119_v0 = vadd.f32 %v1118_v63, %v1117_v62  ;;  %v4208_v32 = vld [vmem:[%s6283_s17] ss:$0 sm:$0xff] }
  0xdd   : > { %4357 = vmatprep.subr.bf16.mxu0 %v4792_v20 }
  0xde   : > { %4378 = vmatpush3.bf16.msra.mxu1 %v4791_v19  ;;  %1120 = vst [vmem:[#allocation2] sm:$0x1] %v1119_v0 }
  0xdf   : > { %4379 = vmatprep.subr.bf16.mxu1 %v4794_v22 }
  0xe0   : > { %4358 = vmatpush3.bf16.msra.mxu0 %v4793_v21 }
  0xe1   : > { %4359 = vmatprep.subr.bf16.mxu0 %v4796_v24 }
  0xe2   : > { %4380 = vmatpush3.bf16.msra.mxu1 %v4795_v23 }
  0xe3   : > { %4381 = vmatprep.subr.bf16.mxu1 %v4798_v26 }
  0xe4   : > { %4360 = vmatpush3.bf16.msra.mxu0 %v4797_v25 }
  0xe5   : > { %4361 = vmatprep.subr.bf16.mxu0 %v4800_v29 }
  0xe6   : > { %4382 = vmatpush3.bf16.msra.mxu1 %v4799_v28 }
  0xe7   : > { %4383 = vmatprep.subr.bf16.mxu1 %v4802_v31 }
  0xe8   : > { %4362 = vmatpush3.bf16.msra.mxu0 %v4801_v30  ;;  %v4207_v30 = vld [vmem:[%s6282_s3] ss:$0 sm:$0xff] }
  0xe9   : > { %4391 = vmatprep.subr.bf16.mxu0 %v4804_v37 }
  0xea   : > { %4384 = vmatpush3.bf16.msra.mxu1 %v4803_v34 }
  0xeb   : > { %1476 = vmatmul.mubr.bf16.vlgmr.msra.gmra.mxu0 %v1131_v41 }
  0xec   : > { %4392 = vmatpush3.bf16.msra.mxu0 %v4806_v45  ;;  %1555 = vmatprep.mubr.bf16.mxu0 %v1148_v52 }
  0xed   : > { %1516 = vmatmul.mubr.bf16.vlgmr.msra.gmra.mxu1 %v1138_v42  ;;  %4393 = vmatprep.subr.bf16.mxu0 %v4807_v46 }
  0xf0   : > { %4394 = vmatpush3.bf16.msra.mxu0 %v4808_v47 }
  0xf1   : > { %4395 = vmatprep.subr.bf16.mxu0 %v4809_v48 }
  0xf4   : > { %4396 = vmatpush3.bf16.msra.mxu0 %v4810_v49 }
  0xf5   : > { %4397 = vmatprep.subr.bf16.mxu0 %v4811_v51 }
  0xf8   : > { %4398 = vmatpush3.bf16.msra.mxu0 %v4812_v53 }
  0xf9   : > { %4399 = vmatprep.subr.bf16.mxu0 %v4813_v54 }
  0xfc   : > { %4400 = vmatpush3.bf16.msra.mxu0 %v4814_v55 }
  0xfd   : > { %4401 = vmatprep.subr.bf16.mxu0 %v4815_v56 }
 0x100   : > { %4402 = vmatpush3.bf16.msra.mxu0 %v4816_v57 }
 0x101   : > { %4403 = vmatprep.subr.bf16.mxu0 %v4817_v58 }
 0x104   : > { %4404 = vmatpush3.bf16.msra.mxu0 %v4818_v59 }
 0x105   : > { %4405 = vmatprep.subr.bf16.mxu0 %v4819_v60 }
 0x108   : > { %4406 = vmatpush3.bf16.msra.mxu0 %v4820_v61 }
 0x10b   : > { %1556 = vmatmul.mubr.bf16.vlgmr.msra.gmra.mxu0 %v4158_v50 }
 0x1ab   : > { %v4363_v2 = vpop.f32.mrf.mxu0 }
 0x1ad   : > { %v4385_v3 = vpop.f32.mrf.mxu1  ;;  %v4364_v4 = vpop.f32.mrf.mxu0 }
 0x1ae   : > { %v4365_v10 = vadd.f32 %v4364_v4, %v4363_v2 }
 0x1af   : > { %v4386_v5 = vpop.f32.mrf.mxu1  ;;  %v4366_v6 = vpop.f32.mrf.mxu0 }
 0x1b0   : > { %v1478_v12 = vadd.f32 %v4365_v10, %v1121_v11  ;;  %v4387_v13 = vadd.f32 %v4386_v5, %v4385_v3 }
 0x1b1   : > { %v4388_v7 = vpop.f32.mrf.mxu1  ;;  %v4367_v8 = vpop.f32.mrf.mxu0 }
 0x1b2   : > { %v1518_v16 = vadd.f32 %v4387_v13, %v1478_v12 }
 0x1b3   : > { %v4389_v9 = vpop.f32.mrf.mxu1 }
 0x1cb   : > { %v4407_v14 = vpop.f32.mrf.mxu0 }
 0x1cd   : > { %v4408_v15 = vpop.f32.mrf.mxu0 }
 0x1ce   : > { %v4409_v17 = vadd.f32 %v4408_v15, %v4407_v14 }
 0x1cf   : > { %v4410_v18 = vpop.f32.mrf.mxu0 }
 0x1d0   : > { %v1558_v19 = vadd.f32 %v4409_v17, %v1518_v16 }
 0x1d1   : > { %v4411_v20 = vpop.f32.mrf.mxu0 }
 0x1d2   : > { %1563 = vst [vmem:[#allocation2 + $0x1] sm:$0xf] %v1558_v19 }
 0x1d9   : > { %v1565_v21 = vld [vmem:[#allocation2] sm:$0xff] }
 0x1da   : > { %1568 = vadd.xlane.f32.xlu0 %v1565_v21 }
 0x263   : > { %v1569_v22 = vpop.xlane.xlu0 %1568 }
 0x264   : > { %v1571_v23 = vmul.f32 0.0078125, %v1569_v22 }
 0x266   : > { %v1572_v24 = vsub.f32 %v1565_v21, %v1571_v23 }
 0x268   : > { %v1573_v25 = vmul.f32 %v1572_v24, %v1572_v24 }
 0x26a   : > { %1574 = vadd.xlane.f32.xlu0 %v1573_v25 }
 0x2f3   : > { %v1575_v26 = vpop.xlane.xlu0 %1574 }
 0x2f4   : > { %v1576_v27 = vmul.f32 0.0078125, %v1575_v26 }
 0x2f6   : > { %v1577_v28 = vadd.f32 1e-05, %v1576_v27 }
 0x2f8   : > { %4821 = vrsqrt.f32 %v1577_v28 }
 0x305   : > { %v4822_v29 = vpop.eup %4821 }
 0x306   : > { %v1579_v31 = vmul.f32 %v4822_v29, %v1572_v24 }
 0x308   : > { %v1586_v33 = vmul.f32 %v4207_v30, %v1579_v31 }
 0x30a   : > { %v1593_v34 = vadd.f32 %v4208_v32, %v1586_v33 }
 0x30c   : > { %1594 = vst [vmem:[#allocation2] sm:$0xff] %v1593_v34 }
 0x30d PF: > { %v4823_v36 = vld [vmem:[%s5697_s30 + $0xac] ss:$12 sps:$4 sm:$0xff]   ;;  %v4825_v37 = vld [vmem:[%s5697_s30 + $0xa8] ss:$12 sps:$4 sm:$0xff]   ;;  %v5333_v38 = vmov 0.0   ;;  %v5334_v57 = vmov 0   ;;  %v1659_v12 = vlaneseq }
 0x30e   : > { %4500 = vmatprep.subr.bf16.mxu1 %v5333_v38  ;;  %v4826_v39 = vld [vmem:[%s5697_s30 + $0xb0] ss:$12 sps:$4 sm:$0xff]   ;;  %v4827_v40 = vld [vmem:[%s5697_s30 + $0x94] ss:$12 sps:$4 sm:$0xff]   ;;  %1802 = vmatprep.subr.bf16.mxu0 %v4823_v36  ;;  %v4830_v42 = vld [vmem:[%s5697_s30 + $0x98] ss:$12 sps:$4 sm:$0xff]  }
 0x30f   : > { %v4829_v41 = vld [vmem:[%s5697_s30 + $0x90] ss:$12 sps:$4 sm:$0xff]   ;;  %1803 = vmatpush1.bf16.msra.mxu0 %v4825_v37  ;;  %4501 = vmatpush3.bf16.msra.mxu1 %v4826_v39  ;;  %v4833_v48 = vld [vmem:[%s5697_s30 + $0x78] ss:$12 sps:$4 sm:$0xff]   ;;  %v4834_v49 = vld [vmem:[%s5697_s30 + $0x80] ss:$12 sps:$4 sm:$0xff]  }
 0x310   : > { %1804 = vmatprep.subr.bf16.mxu0 %v4827_v40  ;;  %4502 = vmatprep.subr.bf16.mxu1 %v5333_v38  ;;  %v4831_v47 = vld [vmem:[%s5697_s30 + $0x7c] ss:$12 sps:$4 sm:$0xff]   ;;  %v4835_v50 = vld [vmem:[%s5697_s30 + $0x64] ss:$12 sps:$4 sm:$0xff]   ;;  %v4837_v51 = vld [vmem:[%s5697_s30 + $0x60] ss:$12 sps:$4 sm:$0xff]  }
 0x311   : > { %v4838_v52 = vld [vmem:[%s5697_s30 + $0x68] ss:$12 sps:$4 sm:$0xff]   ;;  %v4839_v53 = vld [vmem:[%s5697_s30 + $0x4c] ss:$12 sps:$4 sm:$0xff]   ;;  %v4842_v55 = vld [vmem:[%s5697_s30 + $0x50] ss:$12 sps:$4 sm:$0xff]   ;;  %1834 = vmatprep.mubr.bf16.mxu0 %v5334_v57 }
 0x312   : > { %v4841_v54 = vld [vmem:[%s5697_s30 + $0x48] ss:$12 sps:$4 sm:$0xff]   ;;  %vm5335_vm0 = vmmov 0   ;;  %v4845_v58 = vld [vmem:[%s5697_s30 + $0x30] ss:$12 sps:$4 sm:$0xff]   ;;  %s6284_s11 = sld [smem:[#allocation42_spill]] }
 0x313   : > { %v1595_v35 = vld [vmem:[#allocation2] sm:$0xff]  ;;  %1805 = vmatpush1.bf16.msra.mxu0 %v4829_v41  ;;  %4503 = vmatpush3.bf16.msra.mxu1 %v4830_v42  ;;  %v4850_v62 = vld [vmem:[%s5697_s30 + $0x20] ss:$12 sps:$4 sm:$0xff]   ;;  %v4851_v63 = vld [vmem:[%s5697_s30 + $0x4] ss:$12 sps:$4 sm:$0xff]   ;;  %v5833_v13 = vshrl.u32 %v1659_v12, 7 }
 0x314   : > { %1598 = vadd.xlane.f32.xlu0 %v1595_v35  ;;  %4504 = vmatprep.subr.bf16.mxu1 %v5333_v38  ;;  %v4843_v56 = vld [vmem:[%s5697_s30 + $0x34] ss:$12 sps:$4 sm:$0xff]   ;;  %v4846_v59 = vld [vmem:[%s5697_s30 + $0x38] ss:$12 sps:$4 sm:$0xff]   ;;  %v4847_v60 = vld [vmem:[%s5697_s30 + $0x1c] ss:$12 sps:$4 sm:$0xff]  }
 0x315   : > { %1806 = vmatprep.subr.bf16.mxu0 %v4831_v47  ;;  %4516 = vmatprep.mubr.msk.bf16.mxu1 %vm5335_vm0, %v5333_v38  ;;  %v4849_v61 = vld [vmem:[%s5697_s30 + $0x18] ss:$12 sps:$4 sm:$0xff]   ;;  %v4853_v0 = vld [vmem:[%s5697_s30] ss:$12 sps:$4 sm:$0xff]   ;;  %v4854_v1 = vld [vmem:[%s5697_s30 + $0x8] ss:$12 sps:$4 sm:$0xff]  }
 0x316   : > { %s6286_s30 = scalar_lea.vmem [#allocation6], %s5689_s24  ;;  %v1665_v14 = vsub.s32 1, %v5833_v13  ;;  %v5837_v15 = vld [vmem:[%s5735_s10] sm:$0x7]  ;;  %v1661_v16 = vsub.s32 0, %v5833_v13  ;;  %s5336_s10 = smov 32  }
 0x317   : > { %1807 = vmatpush1.bf16.msra.mxu0 %v4833_v48  ;;  %4505 = vmatpush3.bf16.msra.mxu1 %v4834_v49  ;;  %v4210_v8 = vld [vmem:[%s6286_s30] ss:$0 sm:$0xff]  ;;  %s5337_s15 = smov 96   ;;  %s5338_s19 = smov 64   ;;  %v5339_v30 = vmov 1983009808  }
 0x318   : > { %4506 = vmatprep.subr.bf16.mxu1 %v5333_v38  ;;  %1808 = vmatprep.subr.bf16.mxu0 %v4835_v50  ;;  %s6285_s9 = scalar_lea.vmem %s6284_s11, %s5719_s7  ;;  %v1666_v17 = vrot.slane %v5837_v15, %v1665_v14  ;;  %v1662_v22 = vrot.slane %v5837_v15, %v1661_v16  ;;  %v1897_v31 = vunpack.c.l.s4 %v5339_v30  ;;  %v5340_v32 = vmov 1934713408   ;;  %s6287_s16 = sld [smem:[#allocation39_spill]] }
 0x319   : > { %v4209_v6 = vld [vmem:[%s6285_s9] ss:$0 sm:$0xff]  ;;  %v1929_v33 = vunpack.c.l.s4 %v5340_v32  ;;  %vm2337_vm1 = vcmask 261120   ;;  %vm2522_vm2 = vcmask 64512   ;;  %vm2578_vm3 = vcmask 1043456   ;;  %s6289_s26 = scalar_lea.vmem [#allocation11], %s5689_s24 }
 0x31a   : > { %v1898_v34 = vunpack.c.0.s8 %v1897_v31  ;;  %vm2909_vm4 = vcmask 523264   ;;  %vm2911_vm5 = vcmask 785408   ;;  %s6290_s25 = scalar_lea.vmem [#allocation12], %s5689_s24 }
 0x31b   : > { %1809 = vmatpush1.bf16.msra.mxu0 %v4837_v51  ;;  %4507 = vmatpush3.bf16.msra.mxu1 %v4838_v52  ;;  %v1930_v37 = vunpack.c.0.s8 %v1929_v33 }
 0x31c   : > { %1810 = vmatprep.subr.bf16.mxu0 %v4839_v53  ;;  %4508 = vmatprep.subr.bf16.mxu1 %v5333_v38  ;;  %v5855_v39 = vsub.s32 %v1898_v34, %v5833_v13 }
 0x31f   : > { %1811 = vmatpush1.bf16.msra.mxu0 %v4841_v54  ;;  %4509 = vmatpush3.bf16.msra.mxu1 %v4842_v55 }
 0x320   : > { %1812 = vmatprep.subr.bf16.mxu0 %v4843_v56  ;;  %4510 = vmatprep.subr.bf16.mxu1 %v5333_v38 }
 0x323   : > { %1813 = vmatpush1.bf16.msra.mxu0 %v4845_v58  ;;  %4511 = vmatpush3.bf16.msra.mxu1 %v4846_v59 }
 0x324   : > { %1814 = vmatprep.subr.bf16.mxu0 %v4847_v60  ;;  %4512 = vmatprep.subr.bf16.mxu1 %v5333_v38 }
 0x327   : > { %1815 = vmatpush1.bf16.msra.mxu0 %v4849_v61  ;;  %4513 = vmatpush3.bf16.msra.mxu1 %v4850_v62 }
 0x328   : > { %1816 = vmatprep.subr.bf16.mxu0 %v4851_v63  ;;  %4514 = vmatprep.subr.bf16.mxu1 %v5333_v38 }
 0x32b   : > { %1817 = vmatpush1.bf16.msra.mxu0 %v4853_v0  ;;  %4515 = vmatpush3.bf16.msra.mxu1 %v4854_v1 }
 0x32c   : > { %4520 = vmatprep.subr.bf16.mxu1 %v5333_v38  ;;  %4544 = vmatprep.subr.bf16.mxu0 %v5333_v38 }
 0x39d   : > { %v1599_v43 = vpop.xlane.xlu0 %1598 }
 0x39e   : > { %v1601_v44 = vmul.f32 0.0078125, %v1599_v43 }
 0x3a0   : > { %v1602_v45 = vsub.f32 %v1595_v35, %v1601_v44 }
 0x3a2   : > { %v1603_v46 = vmul.f32 %v1602_v45, %v1602_v45 }
 0x3a4   : > { %1604 = vadd.xlane.f32.xlu0 %v1603_v46 }
 0x42d   : > { %v1605_v2 = vpop.xlane.xlu0 %1604 }
 0x42e   : > { %v1606_v3 = vmul.f32 0.0078125, %v1605_v2 }
 0x430   : > { %v1607_v4 = vadd.f32 1e-05, %v1606_v3 }
 0x432   : > { %4943 = vrsqrt.f32 %v1607_v4 }
 0x43f   : > { %v4944_v5 = vpop.eup %4943 }
 0x440   : > { %v1609_v7 = vmul.f32 %v4944_v5, %v1602_v45  ;;  %v5858_v45 = vsub.s32 %v1930_v37, %v5833_v13 }
 0x442   : > { %v1616_v9 = vmul.f32 %v4209_v6, %v1609_v7 }
 0x444   : > { %v1623_v10 = vadd.f32 %v4210_v8, %v1616_v9 }
 0x446   : > { %v1624_v11 = vpack.c.bf16 %v1623_v10, %v1623_v10 }
 0x448   : > { %1835 = vmatmul.mubr.bf16.vlgmr.msra.gmra.mxu0 %v1624_v11  ;;  %4517 = vmatmul.mubr.bf16.vlgmr.msra.gmra.mxu1 %v1624_v11 }
 0x449   : > { %4522 = vmatprep.mubr.msk.bf16.mxu1 %vm5335_vm0, %v5333_v38  ;;  %4546 = vmatprep.mubr.msk.bf16.mxu0 %vm5335_vm0, %v5333_v38 }
 0x508   : > { %v1836_v18 = vpop.f32.mrf.mxu0  ;;  %v5843_v19 = vpop.f32.mrf.mxu1 }
 0x509   : > { %v1837_v28 = vadd.f32 %v1836_v18, %v1662_v22 }
 0x50a   : > { %v1838_v20 = vpop.f32.mrf.mxu0  ;;  %v4518_v21 = vpop.f32.mrf.mxu1 }
 0x50b   : > { %v1839_v23 = vadd.f32 %v1838_v20, %v1666_v17  ;;  %v1883_v29 = vmul.f32 0.17677669, %v1837_v28 }
 0x50c   : > { %v1840_v24 = vpop.f32.mrf.mxu0  ;;  %v1880_v25 = vpop.f32.mrf.mxu1 }
 0x50d   : > { %2037 = vrot.lane.b32.xlu0 %v1839_v23, %s5336_s10  ;;  %2031 = vrot.lane.b32.xlu1 %v1839_v23, %s5337_s15 }
 0x50e   : > { %v1841_v26 = vpop.f32.mrf.mxu0  ;;  %v4519_v27 = vpop.f32.mrf.mxu1 }
 0x511   : > { %2034 = vrot.lane.b32.xlu1 %v1839_v23, %s5338_s19 }
 0x515   : > { %1885 = vrot.lane.b32.xlu1 %v1883_v29, %s5337_s15 }
 0x519   : > { %1888 = vrot.lane.b32.xlu1 %v1883_v29, %s5338_s19 }
 0x51d   : > { %1891 = vrot.lane.b32.xlu1 %v1883_v29, %s5336_s10 }
 0x57f   : > { %v2038_v35 = vpop.permute.xlu0 %2037  ;;  %v2032_v36 = vpop.permute.xlu1 %2031 }
 0x580   : > { %v2056_v40 = vcombine.low %v2032_v36, %v2038_v35  ;;  %v2057_v41 = vcombine.high %v2032_v36, %v2038_v35 }
 0x582   : > { %v2064_v46 = vrot.slane %v2056_v40, %v5855_v39  ;;  %v2071_v47 = vrot.slane %v2057_v41, %v5855_v39 }
 0x583   : > { %v2035_v42 = vpop.permute.xlu1 %2034 }
 0x584   : > { %v2040_v43 = vcombine.low %v1839_v23, %v2035_v42  ;;  %v2041_v44 = vcombine.high %v1839_v23, %v2035_v42 }
 0x586   : > { %v2048_v48 = vrot.slane %v2040_v43, %v5855_v39  ;;  %v2055_v49 = vrot.slane %v2041_v44, %v5855_v39 }
 0x587   : > { %v1886_v50 = vpop.permute.xlu1 %1885 }
 0x588   : > { %v2072_v51 = vcombine.low %v2048_v48, %v2064_v46  ;;  %v2073_v52 = vcombine.high %v2048_v48, %v2064_v46  ;;  %v2088_v53 = vcombine.low %v2055_v49, %v2071_v47  ;;  %v2089_v54 = vcombine.high %v2055_v49, %v2071_v47 }
 0x58a   : > { %v2080_v55 = vrot.slane %v2072_v51, %v5858_v45  ;;  %v2087_v56 = vrot.slane %v2073_v52, %v5858_v45  ;;  %v2096_v58 = vrot.slane %v2088_v53, %v5858_v45  ;;  %v2103_v59 = vrot.slane %v2089_v54, %v5858_v45 }
 0x58b   : > { %v1889_v60 = vpop.permute.xlu1 %1888 }
 0x58c   : > { %v2108_v61 = vcombine.low %v2080_v55, %v2087_v56  ;;  %v4237_v62 = vcombine.high %v2080_v55, %v2087_v56  ;;  %v2124_v63 = vcombine.low %v2096_v58, %v2103_v59  ;;  %v4238_v0 = vcombine.high %v2096_v58, %v2103_v59 }
 0x58d   : > { %v1894_v1 = vcombine.low %v1883_v29, %v1889_v60  ;;  %v1895_v2 = vcombine.high %v1883_v29, %v1889_v60 }
 0x58e   : > { %v2115_v3 = vrot.slane %v2108_v61, %v5855_v39  ;;  %v2123_v4 = vrot.slane %v4237_v62, %v5855_v39  ;;  %v2131_v5 = vrot.slane %v2124_v63, %v5855_v39  ;;  %v2139_v6 = vrot.slane %v4238_v0, %v5855_v39 }
 0x58f   : > { %v1892_v7 = vpop.permute.xlu1 %1891  ;;  %v1902_v12 = vrot.slane %v1894_v1, %v5855_v39  ;;  %v1909_v17 = vrot.slane %v1895_v2, %v5855_v39 }
 0x590   : > { %v1910_v8 = vcombine.low %v1886_v50, %v1892_v7  ;;  %v1911_v9 = vcombine.high %v1886_v50, %v1892_v7  ;;  %v2140_v10 = vcombine.low %v2115_v3, %v2123_v4  ;;  %v2156_v11 = vcombine.low %v2131_v5, %v2139_v6 }
 0x591   : > { %v2141_v44 = vcombine.high %v2115_v3, %v2123_v4  ;;  %v2157_v49 = vcombine.high %v2131_v5, %v2139_v6 }
 0x592   : > { %v1918_v18 = vrot.slane %v1910_v8, %v5855_v39  ;;  %v1925_v20 = vrot.slane %v1911_v9, %v5855_v39  ;;  %v2148_v21 = vrot.slane %v2140_v10, %v5858_v45  ;;  %v2164_v22 = vrot.slane %v2156_v11, %v5858_v45  ;;  %v4241_v11 = vld [vmem:[%s6287_s16] ss:$0 sm:$0xff] }
 0x593   : > { %v2155_v54 = vrot.slane %v2141_v44, %v5858_v45  ;;  %v2171_v55 = vrot.slane %v2157_v49, %v5858_v45 }
 0x594   : > { %v1926_v23 = vcombine.low %v1902_v12, %v1918_v18  ;;  %v1927_v24 = vcombine.high %v1902_v12, %v1918_v18  ;;  %v1942_v25 = vcombine.low %v1909_v17, %v1925_v20  ;;  %v1943_v26 = vcombine.high %v1909_v17, %v1925_v20 }
 0x595   : > { %v2172_v27 = vcombine.low %v2148_v21, %v2164_v22  ;;  %v2173_v48 = vcombine.high %v2148_v21, %v2164_v22  ;;  %v2174_v59 = vcombine.low %v2155_v54, %v2171_v55  ;;  %v2175_v4 = vcombine.high %v2155_v54, %v2171_v55 }
 0x596   : > { %v1934_v28 = vrot.slane %v1926_v23, %v5858_v45  ;;  %v1941_v29 = vrot.slane %v1927_v24, %v5858_v45  ;;  %v1950_v30 = vrot.slane %v1942_v25, %v5858_v45  ;;  %v1957_v31 = vrot.slane %v1943_v26, %v5858_v45 }
 0x597   : > { %v2326_v32 = vpack.c.bf16 %v2172_v27, %v2172_v27  ;;  %v2327_v53 = vpack.c.bf16 %v2173_v48, %v2173_v48  ;;  %v2328_v63 = vpack.c.bf16 %v2174_v59, %v2174_v59  ;;  %v2329_v6 = vpack.c.bf16 %v2175_v4, %v2175_v4 }
 0x598   : > { %v1962_v33 = vcombine.low %v1934_v28, %v1941_v29  ;;  %v4235_v34 = vcombine.high %v1934_v28, %v1941_v29  ;;  %v1978_v35 = vcombine.low %v1950_v30, %v1957_v31  ;;  %v4236_v36 = vcombine.high %v1950_v30, %v1957_v31 }
 0x599   : > { %v2342_v37 = vsel %vm2337_vm1, %v2326_v32, 0  ;;  %v2388_v58 = vsel %vm2337_vm1, %v2327_v53, 0  ;;  %v2434_v3 = vsel %vm2337_vm1, %v2328_v63, 0  ;;  %v2480_v8 = vsel %vm2337_vm1, %v2329_v6, 0 }
 0x59a   : > { %v1969_v40 = vrot.slane %v1962_v33, %v5855_v39  ;;  %v1977_v41 = vrot.slane %v4235_v34, %v5855_v39  ;;  %v1985_v42 = vrot.slane %v1978_v35, %v5855_v39  ;;  %v1993_v43 = vrot.slane %v4236_v36, %v5855_v39  ;;  %4521 = vmatpush3.bf16.xpose.msra.mxu1 %v2342_v37 }
 0x59b   : > { %4526 = vmatprep.subr.bf16.mxu1 %v5333_v38 }
 0x59c   : > { %v1994_v46 = vcombine.low %v1969_v40, %v1977_v41  ;;  %v2010_v47 = vcombine.low %v1985_v42, %v1993_v43  ;;  %v1995_v60 = vcombine.high %v1969_v40, %v1977_v41  ;;  %v2011_v61 = vcombine.high %v1985_v42, %v1993_v43 }
 0x59d   : > { %v1669_v43 = vsub.s32 2, %v5833_v13 }
 0x59e   : > { %v2002_v50 = vrot.slane %v1994_v46, %v5858_v45  ;;  %v2018_v51 = vrot.slane %v2010_v47, %v5858_v45  ;;  %v2009_v1 = vrot.slane %v1995_v60, %v5858_v45  ;;  %v2025_v2 = vrot.slane %v2011_v61, %v5858_v45 }
 0x59f   : > { %v1670_v44 = vrot.slane %v5837_v15, %v1669_v43 }
 0x5a0   : > { %v2026_v52 = vcombine.low %v2002_v50, %v2018_v51  ;;  %v2027_v62 = vcombine.high %v2002_v50, %v2018_v51  ;;  %v2028_v5 = vcombine.low %v2009_v1, %v2025_v2  ;;  %v2029_v9 = vcombine.high %v2009_v1, %v2025_v2 }
 0x5a1   : > { %v1878_v46 = vadd.f32 %v5843_v19, %v1670_v44 }
 0x5a2   : > { %v2322_v56 = vpack.c.bf16 %v2026_v52, %v2026_v52  ;;  %v2323_v0 = vpack.c.bf16 %v2027_v62, %v2027_v62  ;;  %v2324_v7 = vpack.c.bf16 %v2028_v5, %v2028_v5  ;;  %v2325_v10 = vpack.c.bf16 %v2029_v9, %v2029_v9 }
 0x5a4   : > { %4523 = vmatmul.mubr.msk.bf16.vlgmr.msra.gmra.mxu1 %vm2337_vm1, %v2322_v56 }
 0x5a5   : > { %4527 = vmatpush3.bf16.xpose.msra.mxu1 %v2388_v58  ;;  %4528 = vmatprep.mubr.msk.bf16.mxu1 %vm5335_vm0, %v5333_v38 }
 0x5a6   : > { %4532 = vmatprep.subr.bf16.mxu1 %v5333_v38 }
 0x5ac   : > { %4529 = vmatmul.mubr.msk.bf16.vlgmr.msra.gmra.mxu1 %vm2337_vm1, %v2323_v0 }
 0x5ad   : > { %4533 = vmatpush3.bf16.xpose.msra.mxu1 %v2434_v3  ;;  %4534 = vmatprep.mubr.msk.bf16.mxu1 %vm5335_vm0, %v5333_v38 }
 0x5ae   : > { %4538 = vmatprep.subr.bf16.mxu1 %v5333_v38 }
 0x5b4   : > { %4535 = vmatmul.mubr.msk.bf16.vlgmr.msra.gmra.mxu1 %vm2337_vm1, %v2324_v7 }
 0x5b5   : > { %4539 = vmatpush3.bf16.xpose.msra.mxu1 %v2480_v8  ;;  %4540 = vmatprep.mubr.msk.bf16.mxu1 %vm5335_vm0, %v5333_v38 }
 0x5b6   : > { %4550 = vmatprep.subr.bf16.mxu1 %v5333_v38 }
 0x5bc   : > { %4541 = vmatmul.mubr.msk.bf16.vlgmr.msra.gmra.mxu1 %vm2337_vm1, %v2325_v10 }
 0x5bd   : > { %4552 = vmatprep.mubr.msk.bf16.mxu1 %vm5335_vm0, %v5333_v38 }
 0x664   : > { %v2378_v12 = vpop.f32.mrf.mxu1 }
 0x665   : > { %v2379_v17 = vadd.f32 %v4241_v11, %v2378_v12 }
 0x666   : > { %v4524_v18 = vpop.f32.mrf.mxu1 }
 0x667   : > { %v2523_v20 = vsel %vm2522_vm2, %v2379_v17, -inf }
 0x668   : > { %2524 = vmax.xlane.f32.xlu1 %v2523_v20  ;;  %v2381_v21 = vpop.f32.mrf.mxu1 }
 0x66a   : > { %v4525_v22 = vpop.f32.mrf.mxu1 }
 0x66c   : > { %v2424_v23 = vpop.f32.mrf.mxu1 }
 0x66d   : > { %v2425_v24 = vadd.f32 %v4241_v11, %v2424_v23 }
 0x66e   : > { %v4530_v25 = vpop.f32.mrf.mxu1 }
 0x66f   : > { %v2526_v26 = vsel %vm2522_vm2, %v2425_v24, -inf }
 0x670   : > { %2527 = vmax.xlane.f32.xlu0 %v2526_v26  ;;  %v2427_v27 = vpop.f32.mrf.mxu1 }
 0x672   : > { %v4531_v28 = vpop.f32.mrf.mxu1 }
 0x674   : > { %v2470_v29 = vpop.f32.mrf.mxu1 }
 0x675   : > { %v2471_v30 = vadd.f32 %v4241_v11, %v2470_v29 }
 0x676   : > { %v4536_v31 = vpop.f32.mrf.mxu1 }
 0x677   : > { %v2529_v32 = vsel %vm2522_vm2, %v2471_v30, -inf }
 0x678   : > { %2530 = vmax.xlane.f32.xlu1 %v2529_v32  ;;  %v2473_v33 = vpop.f32.mrf.mxu1 }
 0x67a   : > { %v4537_v34 = vpop.f32.mrf.mxu1 }
 0x67c   : > { %v2516_v35 = vpop.f32.mrf.mxu1 }
 0x67d   : > { %v2517_v36 = vadd.f32 %v4241_v11, %v2516_v35 }
 0x67e   : > { %v4542_v37 = vpop.f32.mrf.mxu1 }
 0x67f   : > { %v2532_v40 = vsel %vm2522_vm2, %v2517_v36, -inf }
 0x680   : > { %2533 = vmax.xlane.f32.xlu1 %v2532_v40  ;;  %v2519_v41 = vpop.f32.mrf.mxu1 }
 0x682   : > { %v4543_v42 = vpop.f32.mrf.mxu1 }
 0x691   : > { %2180 = vrot.lane.b32.xlu1 %v1878_v46, %s5338_s19 }
 0x6f1   : > { %v2525_v47 = vpop.xlane.xlu1 %2524 }
 0x6f2   : > { %v2535_v48 = vsub.f32 %v2379_v17, %v2525_v47 }
 0x6f4   : > { %v2539_v49 = vmul.f32 1.442695, %v2535_v48 }
 0x6f6   : > { %4945 = vpow2.f32 %v2539_v49 }
 0x6f9   : > { %v2528_v50 = vpop.xlane.xlu0 %2527 }
 0x6fa   : > { %v2536_v51 = vsub.f32 %v2425_v24, %v2528_v50 }
 0x6fc   : > { %v2541_v52 = vmul.f32 1.442695, %v2536_v51 }
 0x6fe   : > { %4947 = vpow2.f32 %v2541_v52 }
 0x701   : > { %v2531_v19 = vpop.xlane.xlu1 %2530 }
 0x702   : > { %v2537_v56 = vsub.f32 %v2471_v30, %v2531_v19 }
 0x703   : > { %v5925_v53 = vpop.eup %4945 }
 0x704   : > { %v2547_v54 = vsel %vm2522_vm2, %v5925_v53, 0.0  ;;  %v2543_v58 = vmul.f32 1.442695, %v2537_v56 }
 0x705   : > { %2548 = vadd.xlane.f32.xlu0 %v2547_v54 }
 0x706   : > { %4949 = vpow2.f32 %v2543_v58 }
 0x709   : > { %v2534_v59 = vpop.xlane.xlu1 %2533 }
 0x70a   : > { %v2538_v60 = vsub.f32 %v2517_v36, %v2534_v59 }
 0x70b   : > { %v5929_v55 = vpop.eup %4947 }
 0x70c   : > { %v2550_v15 = vsel %vm2522_vm2, %v5929_v55, 0.0  ;;  %v2545_v61 = vmul.f32 1.442695, %v2538_v60 }
 0x70d   : > { %2551 = vadd.xlane.f32.xlu1 %v2550_v15  ;;  %v2181_v2 = vpop.permute.xlu1 %2180 }
 0x70e   : > { %4951 = vpow2.f32 %v2545_v61  ;;  %v2186_v5 = vcombine.low %v1878_v46, %v2181_v2  ;;  %v2187_v6 = vcombine.high %v1878_v46, %v2181_v2 }
 0x710   : > { %v2194_v11 = vrot.slane %v2186_v5, %v5855_v39  ;;  %v2201_v12 = vrot.slane %v2187_v6, %v5855_v39 }
 0x713   : > { %v5935_v62 = vpop.eup %4949 }
 0x714   : > { %v2553_v63 = vsel %vm2522_vm2, %v5935_v62, 0.0 }
 0x71b   : > { %2177 = vrot.lane.b32.xlu0 %v1878_v46, %s5337_s15  ;;  %v5939_v0 = vpop.eup %4951 }
 0x71c   : > { %v2556_v1 = vsel %vm2522_vm2, %v5939_v0, 0.0 }
 0x71e   : > { %2183 = vrot.lane.b32.xlu1 %v1878_v46, %s5336_s10 }
 0x73a   : > { %2554 = vadd.xlane.f32.xlu0 %v2553_v63 }
 0x742   : > { %2557 = vadd.xlane.f32.xlu1 %v2556_v1 }
 0x78e   : > { %v2549_v3 = vpop.xlane.xlu0 %2548 }
 0x78f   : > { %4953 = vrcp.f32 %v2549_v3 }
 0x792   : > { %v2178_v7 = vpop.permute.xlu0 %2177 }
 0x796   : > { %v2552_v4 = vpop.xlane.xlu1 %2551 }
 0x797   : > { %4955 = vrcp.f32 %v2552_v4 }
 0x79a   : > { %v2184_v8 = vpop.permute.xlu1 %2183 }
 0x79b   : > { %v2202_v9 = vcombine.low %v2178_v7, %v2184_v8  ;;  %v2203_v10 = vcombine.high %v2178_v7, %v2184_v8 }
 0x79c   : > { %v4954_v42 = vpop.eup %4953 }
 0x79d   : > { %v2210_v17 = vrot.slane %v2202_v9, %v5855_v39  ;;  %v2217_v18 = vrot.slane %v2203_v10, %v5855_v39  ;;  %v2563_v56 = vmul.f32 %v4954_v42, %v5925_v53 }
 0x79f   : > { %v2218_v20 = vcombine.low %v2194_v11, %v2210_v17  ;;  %v2219_v21 = vcombine.high %v2194_v11, %v2210_v17  ;;  %v2234_v22 = vcombine.low %v2201_v12, %v2217_v18  ;;  %v2235_v23 = vcombine.high %v2201_v12, %v2217_v18  ;;  %v4855_v11 = vld [vmem:[%s5740_s21 + $0x38] sm:$0xff]   ;;  %v4857_v12 = vld [vmem:[%s5740_s21 + $0x28] sm:$0xff]   ;;  %v4858_v17 = vld [vmem:[%s5740_s21 + $0x20] sm:$0xff]  }
 0x7a0   : > { %v2567_v1 = vpack.c.bf16 %v2563_v56, %v2563_v56  ;;  %v4860_v18 = vld [vmem:[%s5740_s21 + $0x10] sm:$0xff]  }
 0x7a1   : > { %v2226_v24 = vrot.slane %v2218_v20, %v5858_v45  ;;  %v2233_v25 = vrot.slane %v2219_v21, %v5858_v45  ;;  %v2242_v26 = vrot.slane %v2234_v22, %v5858_v45  ;;  %v2249_v27 = vrot.slane %v2235_v23, %v5858_v45 }
 0x7a3   : > { %v2254_v28 = vcombine.low %v2226_v24, %v2233_v25  ;;  %v4239_v29 = vcombine.high %v2226_v24, %v2233_v25  ;;  %v2270_v30 = vcombine.low %v2242_v26, %v2249_v27  ;;  %v4240_v31 = vcombine.high %v2242_v26, %v2249_v27 }
 0x7a4   : > { %v4956_v49 = vpop.eup %4955 }
 0x7a5   : > { %v2261_v32 = vrot.slane %v2254_v28, %v5855_v39  ;;  %v2269_v33 = vrot.slane %v4239_v29, %v5855_v39  ;;  %v2277_v34 = vrot.slane %v2270_v30, %v5855_v39  ;;  %v2285_v35 = vrot.slane %v4240_v31, %v5855_v39 }
 0x7a6   : > { %v2564_v58 = vmul.f32 %v4956_v49, %v5929_v55 }
 0x7a7   : > { %v2286_v36 = vcombine.low %v2261_v32, %v2269_v33  ;;  %v2302_v37 = vcombine.low %v2277_v34, %v2285_v35  ;;  %v2287_v40 = vcombine.high %v2261_v32, %v2269_v33  ;;  %v2303_v41 = vcombine.high %v2277_v34, %v2285_v35 }
 0x7a8   : > { %v2568_v2 = vpack.c.bf16 %v2564_v58, %v2564_v58 }
 0x7a9   : > { %v2294_v44 = vrot.slane %v2286_v36, %v5858_v45  ;;  %v2310_v46 = vrot.slane %v2302_v37, %v5858_v45  ;;  %v2301_v47 = vrot.slane %v2287_v40, %v5858_v45  ;;  %v2317_v48 = vrot.slane %v2303_v41, %v5858_v45 }
 0x7ab   : > { %v2318_v50 = vcombine.low %v2294_v44, %v2310_v46  ;;  %v2319_v51 = vcombine.high %v2294_v44, %v2310_v46  ;;  %v2320_v52 = vcombine.low %v2301_v47, %v2317_v48  ;;  %v2321_v54 = vcombine.high %v2301_v47, %v2317_v48 }
 0x7ad   : > { %v2571_v15 = vpack.c.bf16 %v2318_v50, %v2318_v50  ;;  %v2572_v19 = vpack.c.bf16 %v2319_v51, %v2319_v51  ;;  %v2573_v61 = vpack.c.bf16 %v2320_v52, %v2320_v52  ;;  %v2574_v63 = vpack.c.bf16 %v2321_v54, %v2321_v54  ;;  %v4861_v51 = vld [vmem:[%s5740_s21 + $0x8] sm:$0xff]  }
 0x7af   : > { %v2580_v59 = vsel %vm2578_vm3, %v2571_v15, 0  ;;  %v2626_v60 = vsel %vm2578_vm3, %v2572_v19, 0  ;;  %v2672_v53 = vsel %vm2578_vm3, %v2573_v61, 0  ;;  %v2718_v55 = vsel %vm2578_vm3, %v2574_v63, 0  ;;  %v4862_v63 = vld [vmem:[%s5740_s21] sm:$0xff]  }
 0x7b0   : > { %4545 = vmatpush3.bf16.msra.mxu0 %v2580_v59  ;;  %4551 = vmatpush3.bf16.msra.mxu1 %v2626_v60 }
 0x7b1   : > { %4556 = vmatprep.subr.bf16.mxu0 %v5333_v38  ;;  %4562 = vmatprep.subr.bf16.mxu1 %v5333_v38 }
 0x7b3   : > { %4547 = vmatmul.mubr.msk.bf16.vlgmr.msra.gmra.mxu0 %vm2522_vm2, %v2567_v1  ;;  %4553 = vmatmul.mubr.msk.bf16.vlgmr.msra.gmra.mxu1 %vm2522_vm2, %v2568_v2 }
 0x7b4   : > { %4557 = vmatpush3.bf16.msra.mxu0 %v2672_v53  ;;  %4563 = vmatpush3.bf16.msra.mxu1 %v2718_v55 }
 0x7b5   : > { %4558 = vmatprep.mubr.msk.bf16.mxu0 %vm5335_vm0, %v5333_v38  ;;  %4564 = vmatprep.mubr.msk.bf16.mxu1 %vm5335_vm0, %v5333_v38 }
 0x7b6   : > { %4568 = vmatprep.subr.bf16.mxu0 %v5333_v38 }
 0x7c3   : > { %v2555_v3 = vpop.xlane.xlu0 %2554 }
 0x7c4   : > { %4957 = vrcp.f32 %v2555_v3 }
 0x7cb   : > { %v2558_v4 = vpop.xlane.xlu1 %2557 }
 0x7cc   : > { %4959 = vrcp.f32 %v2558_v4 }
 0x7d1   : > { %v4958_v5 = vpop.eup %4957 }
 0x7d2   : > { %v2565_v6 = vmul.f32 %v4958_v5, %v5935_v62  ;;  %v4856_v62 = vld [vmem:[%s5740_s21 + $0x30] sm:$0xff]  }
 0x7d4   : > { %v2569_v7 = vpack.c.bf16 %v2565_v6, %v2565_v6 }
 0x7d6   : > { %4559 = vmatmul.mubr.msk.bf16.vlgmr.msra.gmra.mxu0 %vm2522_vm2, %v2569_v7 }
 0x7d7   : > { %4584 = vmatprep.mubr.msk.bf16.mxu0 %vm5335_vm0, %v5333_v38  ;;  %4569 = vmatpush3.bf16.msra.mxu0 %v4855_v11 }
 0x7d8   : > { %4570 = vmatprep.subr.bf16.mxu0 %v5333_v38 }
 0x7d9   : > { %v4960_v8 = vpop.eup %4959 }
 0x7da   : > { %v2566_v9 = vmul.f32 %v4960_v8, %v5939_v0  ;;  %v4859_v0 = vld [vmem:[%s5740_s21 + $0x18] sm:$0xff]   ;;  %s6288_s21 = scalar_lea.vmem [#allocation9], %s5689_s24 }
 0x7db   : > { %4571 = vmatpush3.bf16.msra.mxu0 %v4856_v62 }
 0x7dc   : > { %v2570_v10 = vpack.c.bf16 %v2566_v9, %v2566_v9  ;;  %4572 = vmatprep.subr.bf16.mxu0 %v5333_v38 }
 0x7de   : > { %4565 = vmatmul.mubr.msk.bf16.vlgmr.msra.gmra.mxu1 %vm2522_vm2, %v2570_v10 }
 0x7df   : > { %3300 = vmatprep.mubr.bf16.mxu1 %v5334_v57  ;;  %4573 = vmatpush3.bf16.msra.mxu0 %v4857_v12 }
 0x7e0   : > { %4574 = vmatprep.subr.bf16.mxu0 %v5333_v38 }
 0x7e3   : > { %4575 = vmatpush3.bf16.msra.mxu0 %v4858_v17 }
 0x7e4   : > { %4576 = vmatprep.subr.bf16.mxu0 %v5333_v38 }
 0x7e7   : > { %4577 = vmatpush3.bf16.msra.mxu0 %v4859_v0 }
 0x7e8   : > { %4578 = vmatprep.subr.bf16.mxu0 %v5333_v38 }
 0x7eb   : > { %4579 = vmatpush3.bf16.msra.mxu0 %v4860_v18 }
 0x7ec   : > { %4580 = vmatprep.subr.bf16.mxu0 %v5333_v38 }
 0x7ef   : > { %4581 = vmatpush3.bf16.msra.mxu0 %v4861_v51  ;;  %v4884_v51 = vld [vmem:[%s5747_s12 + $0x88] ss:$16 sps:$4 sm:$0xff]  }
 0x7f0   : > { %4582 = vmatprep.subr.bf16.mxu0 %v5333_v38 }
 0x7f3   : > { %4583 = vmatpush3.bf16.msra.mxu0 %v4862_v63  ;;  %v4901_v63 = vld [vmem:[%s5747_s12 + $0x24] ss:$16 sps:$4 sm:$0xff]  }
 0x873   : > { %v2616_v20 = vpop.f32.mrf.mxu0  ;;  %v2662_v21 = vpop.f32.mrf.mxu1 }
 0x875   : > { %v4548_v22 = vpop.f32.mrf.mxu0  ;;  %v4554_v23 = vpop.f32.mrf.mxu1 }
 0x876   : > { %v4252_v22 = vld [vmem:[%s6288_s21] ss:$0 sm:$0xff] }
 0x877   : > { %v2619_v24 = vpop.f32.mrf.mxu0  ;;  %v2665_v25 = vpop.f32.mrf.mxu1 }
 0x879   : > { %v4549_v26 = vpop.f32.mrf.mxu0  ;;  %v4555_v27 = vpop.f32.mrf.mxu1 }
 0x87a   : > { %v4979_v26 = vld [vmem:[#allocation2] sm:$0xff] }
 0x896   : > { %v2708_v28 = vpop.f32.mrf.mxu0 }
 0x897   : > { %v2760_v32 = vcombine.low %v2616_v20, %v2708_v28  ;;  %v2761_v33 = vcombine.high %v2616_v20, %v2708_v28 }
 0x898   : > { %v4560_v29 = vpop.f32.mrf.mxu0 }
 0x899   : > { %v2768_v40 = vrot.slane %v2760_v32, %v5855_v39  ;;  %v2775_v41 = vrot.slane %v2761_v33, %v5855_v39  ;;  %v4866_v32 = vld [vmem:[%s5747_s12 + $0xe8] ss:$16 sps:$4 sm:$0xff]   ;;  %v4868_v33 = vld [vmem:[%s5747_s12 + $0xec] ss:$16 sps:$4 sm:$0xff]  }
 0x89a   : > { %v2711_v30 = vpop.f32.mrf.mxu0  ;;  %3309 = vmatprep.subr.bf16.mxu0 %v4868_v33  ;;  %v4927_v33 = vld [vmem:[%s5757_s18 + $0x58] sm:$0xff]  }
 0x89b   : > { %v4863_v30 = vld [vmem:[%s5747_s12 + $0xe0] ss:$16 sps:$4 sm:$0xff]  }
 0x89c   : > { %v4561_v31 = vpop.f32.mrf.mxu0 }
 0x89d   : > { %v4865_v31 = vld [vmem:[%s5747_s12 + $0xe4] ss:$16 sps:$4 sm:$0xff]  }
 0x89e   : > { %v2754_v34 = vpop.f32.mrf.mxu1  ;;  %3268 = vmatprep.subr.bf16.mxu1 %v4865_v31  ;;  %v4925_v31 = vld [vmem:[%s5757_s18 + $0x20] sm:$0xff]  }
 0x89f   : > { %v2776_v35 = vcombine.low %v2662_v21, %v2754_v34  ;;  %v2777_v36 = vcombine.high %v2662_v21, %v2754_v34  ;;  %v4874_v34 = vld [vmem:[%s5747_s12 + $0xcc] ss:$16 sps:$4 sm:$0xff]   ;;  %3269 = vmatpush1.bf16.msra.mxu1 %v4863_v30  ;;  %v4924_v30 = vld [vmem:[%s5757_s18 + $0xe0] sm:$0xff]  }
 0x8a0   : > { %v4566_v37 = vpop.f32.mrf.mxu1 }
 0x8a1   : > { %v2784_v42 = vrot.slane %v2776_v35, %v5855_v39  ;;  %v2791_v44 = vrot.slane %v2777_v36, %v5855_v39  ;;  %v4869_v35 = vld [vmem:[%s5747_s12 + $0xc0] ss:$16 sps:$4 sm:$0xff]   ;;  %v4872_v36 = vld [vmem:[%s5747_s12 + $0xc8] ss:$16 sps:$4 sm:$0xff]  }
 0x8a2   : > { %v2757_v46 = vpop.f32.mrf.mxu1 }
 0x8a3   : > { %v2792_v47 = vcombine.low %v2768_v40, %v2784_v42  ;;  %v2793_v48 = vcombine.high %v2768_v40, %v2784_v42  ;;  %v2808_v49 = vcombine.low %v2775_v41, %v2791_v44  ;;  %v2809_v50 = vcombine.high %v2775_v41, %v2791_v44  ;;  %v4877_v44 = vld [vmem:[%s5747_s12 + $0xa4] ss:$16 sps:$4 sm:$0xff]   ;;  %v4880_v46 = vld [vmem:[%s5747_s12 + $0xac] ss:$16 sps:$4 sm:$0xff]  }
 0x8a4   : > { %v4567_v52 = vpop.f32.mrf.mxu1 }
 0x8a5   : > { %v2800_v54 = vrot.slane %v2792_v47, %v5858_v45  ;;  %v2807_v15 = vrot.slane %v2793_v48, %v5858_v45  ;;  %v2816_v19 = vrot.slane %v2808_v49, %v5858_v45  ;;  %v2823_v56 = vrot.slane %v2809_v50, %v5858_v45  ;;  %v4875_v47 = vld [vmem:[%s5747_s12 + $0xa0] ss:$16 sps:$4 sm:$0xff]   ;;  %v4878_v48 = vld [vmem:[%s5747_s12 + $0xa8] ss:$16 sps:$4 sm:$0xff]   ;;  %v4883_v50 = vld [vmem:[%s5747_s12 + $0x84] ss:$16 sps:$4 sm:$0xff]  }
 0x8a6   : > { %v4881_v49 = vld [vmem:[%s5747_s12 + $0x80] ss:$16 sps:$4 sm:$0xff]   ;;  %v4886_v52 = vld [vmem:[%s5747_s12 + $0x8c] ss:$16 sps:$4 sm:$0xff]  }
 0x8a7   : > { %v2828_v58 = vcombine.low %v2800_v54, %v2807_v15  ;;  %v4250_v59 = vcombine.high %v2800_v54, %v2807_v15  ;;  %v2844_v60 = vcombine.low %v2816_v19, %v2823_v56  ;;  %v4251_v61 = vcombine.high %v2816_v19, %v2823_v56  ;;  %v4889_v54 = vld [vmem:[%s5747_s12 + $0x64] ss:$16 sps:$4 sm:$0xff]   ;;  %v4892_v15 = vld [vmem:[%s5747_s12 + $0x6c] ss:$16 sps:$4 sm:$0xff]   ;;  %v4887_v19 = vld [vmem:[%s5747_s12 + $0x60] ss:$16 sps:$4 sm:$0xff]  }
 0x8a8   : > { %v4890_v56 = vld [vmem:[%s5747_s12 + $0x68] ss:$16 sps:$4 sm:$0xff]  }
 0x8a9   : > { %v2835_v1 = vrot.slane %v2828_v58, %v5855_v39  ;;  %v2843_v2 = vrot.slane %v4250_v59, %v5855_v39  ;;  %v2851_v53 = vrot.slane %v2844_v60, %v5855_v39  ;;  %v2859_v55 = vrot.slane %v4251_v61, %v5855_v39  ;;  %v4895_v58 = vld [vmem:[%s5747_s12 + $0x44] ss:$16 sps:$4 sm:$0xff]   ;;  %v4898_v59 = vld [vmem:[%s5747_s12 + $0x4c] ss:$16 sps:$4 sm:$0xff]   ;;  %v4893_v60 = vld [vmem:[%s5747_s12 + $0x40] ss:$16 sps:$4 sm:$0xff]  }
 0x8aa   : > { %v4896_v61 = vld [vmem:[%s5747_s12 + $0x48] ss:$16 sps:$4 sm:$0xff]  }
 0x8ab   : > { %v2861_v3 = vcombine.high %v2835_v1, %v2843_v2  ;;  %v2877_v4 = vcombine.high %v2851_v53, %v2859_v55  ;;  %v2860_v5 = vcombine.low %v2835_v1, %v2843_v2  ;;  %v2876_v6 = vcombine.low %v2851_v53, %v2859_v55  ;;  %v4904_v1 = vld [vmem:[%s5747_s12 + $0x2c] ss:$16 sps:$4 sm:$0xff]   ;;  %v4899_v2 = vld [vmem:[%s5747_s12 + $0x20] ss:$16 sps:$4 sm:$0xff]   ;;  %v4902_v53 = vld [vmem:[%s5747_s12 + $0x28] ss:$16 sps:$4 sm:$0xff]  }
 0x8ac   : > { %v4907_v55 = vld [vmem:[%s5747_s12 + $0x4] ss:$16 sps:$4 sm:$0xff]  }
 0x8ad   : > { %v2875_v38 = vrot.slane %v2861_v3, %v5858_v45  ;;  %v2891_v7 = vrot.slane %v2877_v4, %v5858_v45  ;;  %v2868_v8 = vrot.slane %v2860_v5, %v5858_v45  ;;  %v2884_v9 = vrot.slane %v2876_v6, %v5858_v45  ;;  %v4910_v3 = vld [vmem:[%s5747_s12 + $0xc] ss:$16 sps:$4 sm:$0xff]   ;;  %v4905_v4 = vld [vmem:[%s5747_s12] ss:$16 sps:$4 sm:$0xff]   ;;  %v4908_v5 = vld [vmem:[%s5747_s12 + $0x8] ss:$16 sps:$4 sm:$0xff]  }
 0x8af   : > { %v2894_v10 = vcombine.low %v2875_v38, %v2891_v7  ;;  %v2893_v11 = vcombine.high %v2868_v8, %v2884_v9  ;;  %v2892_v62 = vcombine.low %v2868_v8, %v2884_v9  ;;  %v2895_v39 = vcombine.high %v2875_v38, %v2891_v7  ;;  %v4261_v9 = vld [vmem:[%s6289_s26] ss:$0 sm:$0xff] }
 0x8b1   : > { %2901 = vrot.lane.b32.xlu1 %v2894_v10, %s5338_s19  ;;  %2897 = vrot.lane.b32.xlu0 %v2893_v11, %s5336_s10  ;;  %v4262_v11 = vld [vmem:[%s6290_s25] ss:$0 sm:$0xff] }
 0x8b5   : > { %2905 = vrot.lane.b32.xlu0 %v2895_v39, %s5337_s15 }
 0x923   : > { %v2898_v12 = vpop.permute.xlu0 %2897  ;;  %v2902_v17 = vpop.permute.xlu1 %2901 }
 0x924   : > { %v2908_v0 = vsel %vm2337_vm1, %v2892_v62, %v2898_v12 }
 0x925   : > { %v2910_v45 = vsel %vm2909_vm4, %v2908_v0, %v2902_v17  ;;  %v4911_v17 = vld [vmem:[%s5757_s18 + $0x78] sm:$0xff]  }
 0x926   : > { %v4912_v0 = vld [vmem:[%s5757_s18 + $0xf8] sm:$0xff]  }
 0x927   : > { %v2906_v18 = vpop.permute.xlu0 %2905 }
 0x928   : > { %v2912_v20 = vsel %vm2911_vm5, %v2910_v45, %v2906_v18  ;;  %v4913_v18 = vld [vmem:[%s5757_s18 + $0x38] sm:$0xff]  }
 0x929   : > { %v2913_v21 = vpack.c.bf16 %v2912_v20, %v2912_v20  ;;  %v4914_v45 = vld [vmem:[%s5757_s18 + $0xb8] sm:$0xff]   ;;  %v4915_v20 = vld [vmem:[%s5757_s18 + $0x70] sm:$0xff]  }
 0x92b   : > { %4585 = vmatmul.mubr.bf16.vlgmr.msra.gmra.mxu0 %v2913_v21  ;;  %v4916_v21 = vld [vmem:[%s5757_s18 + $0xf0] sm:$0xff]  }
 0x92c   : > { %3341 = vmatprep.mubr.bf16.mxu0 %v5334_v57  ;;  %v4871_v57 = vld [vmem:[%s5747_s12 + $0xc4] ss:$16 sps:$4 sm:$0xff]   ;;  %3310 = vmatpush1.bf16.msra.mxu0 %v4866_v32 }
 0x92d   : > { %3270 = vmatprep.subr.bf16.mxu1 %v4871_v57  ;;  %3311 = vmatprep.subr.bf16.mxu0 %v4874_v34  ;;  %v4926_v32 = vld [vmem:[%s5757_s18 + $0xa0] sm:$0xff]   ;;  %v4928_v57 = vld [vmem:[%s5757_s18 + $0xd8] sm:$0xff]  }
 0x92e   : > { %3271 = vmatpush1.bf16.msra.mxu1 %v4869_v35  ;;  %v4929_v34 = vld [vmem:[%s5757_s18 + $0x18] sm:$0xff]  }
 0x92f   : > { %3272 = vmatprep.subr.bf16.mxu1 %v4877_v44  ;;  %v4930_v35 = vld [vmem:[%s5757_s18 + $0x98] sm:$0xff]   ;;  %v4936_v44 = vld [vmem:[%s5757_s18 + $0xc8] sm:$0xff]  }
 0x930   : > { %3312 = vmatpush1.bf16.msra.mxu0 %v4872_v36  ;;  %v4931_v36 = vld [vmem:[%s5757_s18 + $0x50] sm:$0xff]  }
 0x931   : > { %3313 = vmatprep.subr.bf16.mxu0 %v4880_v46  ;;  %v4937_v46 = vld [vmem:[%s5757_s18 + $0x8] sm:$0xff]  }
 0x932   : > { %3273 = vmatpush1.bf16.msra.mxu1 %v4875_v47  ;;  %v4938_v47 = vld [vmem:[%s5757_s18 + $0x88] sm:$0xff]  }
 0x933   : > { %3274 = vmatprep.subr.bf16.mxu1 %v4883_v50  ;;  %v4941_v50 = vld [vmem:[%s5757_s18] sm:$0xff]  }
 0x934   : > { %3314 = vmatpush1.bf16.msra.mxu0 %v4878_v48  ;;  %v4939_v48 = vld [vmem:[%s5757_s18 + $0x40] sm:$0xff]  }
 0x935   : > { %3315 = vmatprep.subr.bf16.mxu0 %v4886_v52  ;;  %v3086_v52 = vld [vmem:[%s5752_s29] sm:$0xf] }
 0x936   : > { %3275 = vmatpush1.bf16.msra.mxu1 %v4881_v49  ;;  %v4940_v49 = vld [vmem:[%s5757_s18 + $0xc0] sm:$0xff]  }
 0x937   : > { %3276 = vmatprep.subr.bf16.mxu1 %v4889_v54  ;;  %v3102_v54 = vsub.s32 3, %v5833_v13 }
 0x938   : > { %3316 = vmatpush1.bf16.msra.mxu0 %v4884_v51  ;;  %v4942_v51 = vld [vmem:[%s5757_s18 + $0x80] sm:$0xff]  }
 0x939   : > { %3317 = vmatprep.subr.bf16.mxu0 %v4892_v15  ;;  %v3091_v15 = vrot.slane %v3086_v52, %v1661_v16 }
 0x93a   : > { %3277 = vmatpush1.bf16.msra.mxu1 %v4887_v19  ;;  %v3099_v19 = vrot.slane %v3086_v52, %v1669_v43 }
 0x93b   : > { %3278 = vmatprep.subr.bf16.mxu1 %v4895_v58  ;;  %v3103_v58 = vrot.slane %v3086_v52, %v3102_v54 }
 0x93c   : > { %3318 = vmatpush1.bf16.msra.mxu0 %v4890_v56  ;;  %v3095_v56 = vrot.slane %v3086_v52, %v1665_v14 }
 0x93d   : > { %3319 = vmatprep.subr.bf16.mxu0 %v4898_v59 }
 0x93e   : > { %3279 = vmatpush1.bf16.msra.mxu1 %v4893_v60 }
 0x93f   : > { %3280 = vmatprep.subr.bf16.mxu1 %v4901_v63 }
 0x940   : > { %3320 = vmatpush1.bf16.msra.mxu0 %v4896_v61 }
 0x941   : > { %3321 = vmatprep.subr.bf16.mxu0 %v4904_v1 }
 0x942   : > { %3281 = vmatpush1.bf16.msra.mxu1 %v4899_v2 }
 0x943   : > { %3282 = vmatprep.subr.bf16.mxu1 %v4907_v55 }
 0x944   : > { %3322 = vmatpush1.bf16.msra.mxu0 %v4902_v53 }
 0x945   : > { %3323 = vmatprep.subr.bf16.mxu0 %v4910_v3 }
 0x946   : > { %3283 = vmatpush1.bf16.msra.mxu1 %v4905_v4 }
 0x947   : > { %4447 = vmatprep.subr.bf16.mxu1 %v4911_v17 }
 0x948   : > { %3324 = vmatpush1.bf16.msra.mxu0 %v4908_v5 }
 0x949   : > { %4469 = vmatprep.subr.bf16.mxu0 %v4912_v0 }
 0x9eb   : > { %v3019_v23 = vpop.f32.mrf.mxu0 }
 0x9ec   : > { %v3020_v24 = vadd.f32 %v4252_v22, %v3019_v23  ;;  %v4917_v22 = vld [vmem:[%s5757_s18 + $0x30] sm:$0xff]  }
 0x9ed   : > { %v4586_v25 = vpop.f32.mrf.mxu0  ;;  %v4918_v23 = vld [vmem:[%s5757_s18 + $0xb0] sm:$0xff]  }
 0x9ee   : > { %v6019_v27 = vadd.f32 %v4979_v26, %v3020_v24  ;;  %v4919_v24 = vld [vmem:[%s5757_s18 + $0x68] sm:$0xff]  }
 0x9ef   : > { %v3022_v28 = vpop.f32.mrf.mxu0  ;;  %v4920_v25 = vld [vmem:[%s5757_s18 + $0xe8] sm:$0xff]  }
 0x9f0   : > { %3028 = vadd.xlane.f32.xlu1 %v6019_v27  ;;  %v4921_v26 = vld [vmem:[%s5757_s18 + $0x28] sm:$0xff]  }
 0x9f1   : > { %v4587_v29 = vpop.f32.mrf.mxu0  ;;  %v4922_v28 = vld [vmem:[%s5757_s18 + $0xa8] sm:$0xff]  }
 0x9f2   : > { %v4923_v29 = vld [vmem:[%s5757_s18 + $0x60] sm:$0xff]  }
 0xa79   : > { %v3029_v37 = vpop.xlane.xlu1 %3028 }
 0xa7a   : > { %v3030_v40 = vmul.f32 0.0078125, %v3029_v37  ;;  %v4932_v37 = vld [vmem:[%s5757_s18 + $0xd0] sm:$0xff]  }
 0xa7c   : > { %v3031_v41 = vsub.f32 %v6019_v27, %v3030_v40  ;;  %v4933_v40 = vld [vmem:[%s5757_s18 + $0x10] sm:$0xff]  }
 0xa7e   : > { %v3032_v42 = vmul.f32 %v3031_v41, %v3031_v41 }
 0xa80   : > { %3033 = vadd.xlane.f32.xlu0 %v3032_v42  ;;  %v4935_v42 = vld [vmem:[%s5757_s18 + $0x48] sm:$0xff]  }
 0xb09   : > { %v3034_v6 = vpop.xlane.xlu0 %3033 }
 0xb0a   : > { %v3035_v38 = vmul.f32 0.0078125, %v3034_v6 }
 0xb0c   : > { %v3036_v7 = vadd.f32 1e-05, %v3035_v38 }
 0xb0e   : > { %4961 = vrsqrt.f32 %v3036_v7 }
 0xb1b   : > { %v4962_v8 = vpop.eup %4961 }
 0xb1c   : > { %v3038_v10 = vmul.f32 %v4962_v8, %v3031_v41  ;;  %v4934_v41 = vld [vmem:[%s5757_s18 + $0x90] sm:$0xff]   ;;  %s6292_s18 = sld [smem:[#allocation25_spill]] }
 0xb1e   : > { %v3045_v62 = vmul.f32 %v4261_v9, %v3038_v10 }
 0xb20   : > { %v3052_v39 = vadd.f32 %v4262_v11, %v3045_v62 }
 0xb22   : > { %v3053_v12 = vpack.c.bf16 %v3052_v39, %v3052_v39  ;;  %p4332_p13 = scmp.ne.s32.totalorder %s6292_s18, 1 }
 0xb23   : > { %s6293_s0 = sld [smem:[#allocation53_spill]] (!%p4332_p13) }
 0xb24   : > { %3301 = vmatmul.mubr.bf16.vlgmr.msra.gmra.mxu1 %v3053_v12  ;;  %3342 = vmatmul.mubr.bf16.vlgmr.msra.gmra.mxu0 %v3053_v12  ;;  %s6294_s20 = sld [smem:[#allocation54_spill]] (!%p4332_p13) }
 0xb25   : > { %4448 = vmatpush3.bf16.msra.mxu1 %v4913_v18  ;;  %4470 = vmatpush3.bf16.msra.mxu0 %v4914_v45 }
 0xb26   : > { %4449 = vmatprep.subr.bf16.mxu1 %v4915_v20  ;;  %4471 = vmatprep.subr.bf16.mxu0 %v4916_v21 }
 0xb29   : > { %4450 = vmatpush3.bf16.msra.mxu1 %v4917_v22  ;;  %4472 = vmatpush3.bf16.msra.mxu0 %v4918_v23 }
 0xb2a   : > { %4451 = vmatprep.subr.bf16.mxu1 %v4919_v24  ;;  %4473 = vmatprep.subr.bf16.mxu0 %v4920_v25 }
 0xb2d   : > { %4452 = vmatpush3.bf16.msra.mxu1 %v4921_v26  ;;  %4474 = vmatpush3.bf16.msra.mxu0 %v4922_v28 }
 0xb2e   : > { %4453 = vmatprep.subr.bf16.mxu1 %v4923_v29  ;;  %4475 = vmatprep.subr.bf16.mxu0 %v4924_v30 }
 0xb31   : > { %4454 = vmatpush3.bf16.msra.mxu1 %v4925_v31  ;;  %4476 = vmatpush3.bf16.msra.mxu0 %v4926_v32 }
 0xb32   : > { %4455 = vmatprep.subr.bf16.mxu1 %v4927_v33  ;;  %4477 = vmatprep.subr.bf16.mxu0 %v4928_v57  ;;  %v4299_v57 = vld [vmem:[%s1013_s22] ss:$0 sm:$0xff] }
 0xb35   : > { %4456 = vmatpush3.bf16.msra.mxu1 %v4929_v34  ;;  %4478 = vmatpush3.bf16.msra.mxu0 %v4930_v35 }
 0xb36   : > { %4457 = vmatprep.subr.bf16.mxu1 %v4931_v36  ;;  %4479 = vmatprep.subr.bf16.mxu0 %v4932_v37 }
 0xb39   : > { %4458 = vmatpush3.bf16.msra.mxu1 %v4933_v40  ;;  %4480 = vmatpush3.bf16.msra.mxu0 %v4934_v41 }
 0xb3a   : > { %4459 = vmatprep.subr.bf16.mxu1 %v4935_v42  ;;  %4481 = vmatprep.subr.bf16.mxu0 %v4936_v44 }
 0xb3d   : > { %4460 = vmatpush3.bf16.msra.mxu1 %v4937_v46  ;;  %4482 = vmatpush3.bf16.msra.mxu0 %v4938_v47 }
 0xb3e   : > { %4461 = vmatprep.subr.bf16.mxu1 %v4939_v48  ;;  %4483 = vmatprep.subr.bf16.mxu0 %v4940_v49 }
 0xb41   : > { %4462 = vmatpush3.bf16.msra.mxu1 %v4941_v50  ;;  %4484 = vmatpush3.bf16.msra.mxu0 %v4942_v51 }
 0xbe4   : > { %v3302_v59 = vpop.f32.mrf.mxu1  ;;  %v3343_v60 = vpop.f32.mrf.mxu0 }
 0xbe5   : > { %v3303_v61 = vadd.f32 %v3302_v59, %v3091_v15  ;;  %v3344_v63 = vadd.f32 %v3343_v60, %v3099_v19 }
 0xbe6   : > { %v3304_v1 = vpop.f32.mrf.mxu1  ;;  %v3345_v2 = vpop.f32.mrf.mxu0 }
 0xbe7   : > { %v4295_v53 = vmul.f32 -1.702, %v3303_v61  ;;  %v4297_v55 = vmul.f32 -1.702, %v3344_v63  ;;  %v3305_v3 = vadd.f32 %v3304_v1, %v3095_v56  ;;  %v3346_v4 = vadd.f32 %v3345_v2, %v3103_v58 }
 0xbe8   : > { %v3306_v5 = vpop.f32.mrf.mxu1  ;;  %v3347_v6 = vpop.f32.mrf.mxu0 }
 0xbe9   : > { %v3358_v16 = vmul.f32 1.442695, %v4295_v53  ;;  %v3362_v38 = vmul.f32 1.442695, %v4297_v55  ;;  %v4296_v7 = vmul.f32 -1.702, %v3305_v3 }
 0xbea   : > { %v4298_v43 = vmul.f32 -1.702, %v3346_v4  ;;  %v3307_v8 = vpop.f32.mrf.mxu1  ;;  %v3348_v13 = vpop.f32.mrf.mxu0 }
 0xbeb   : > { %4963 = vpow2.f32 %v3358_v16  ;;  %v3360_v14 = vmul.f32 1.442695, %v4296_v7 }
 0xbec   : > { %4965 = vpow2.f32 %v3362_v38  ;;  %v3364_v9 = vmul.f32 1.442695, %v4298_v43 }
 0xbed   : > { %4967 = vpow2.f32 %v3360_v14 }
 0xbee   : > { %4969 = vpow2.f32 %v3364_v9 }
 0xbf8   : > { %v4964_v10 = vpop.eup %4963 }
 0xbf9   : > { %v4966_v11 = vpop.eup %4965  ;;  %v3366_v62 = vadd.f32 1.0, %v4964_v10 }
 0xbfa   : > { %v4968_v39 = vpop.eup %4967  ;;  %v3368_v12 = vadd.f32 1.0, %v4966_v11 }
 0xbfb   : > { %v4970_v17 = vpop.eup %4969  ;;  %4971 = vrcp.f32 %v3366_v62  ;;  %v3367_v0 = vadd.f32 1.0, %v4968_v39 }
 0xbfc   : > { %4973 = vrcp.f32 %v3368_v12  ;;  %v3369_v18 = vadd.f32 1.0, %v4970_v17 }
 0xbfd   : > { %4975 = vrcp.f32 %v3367_v0 }
 0xbfe   : > { %4977 = vrcp.f32 %v3369_v18 }
 0xc08   : > { %v4972_v45 = vpop.eup %4971 }
 0xc09   : > { %v4974_v20 = vpop.eup %4973  ;;  %v3378_v22 = vmul.f32 %v4972_v45, %v3303_v61 }
 0xc0a   : > { %v4976_v21 = vpop.eup %4975  ;;  %v3380_v24 = vmul.f32 %v4974_v20, %v3344_v63 }
 0xc0b   : > { %v4978_v23 = vpop.eup %4977  ;;  %v3379_v25 = vmul.f32 %v4976_v21, %v3305_v3  ;;  %v3382_v29 = vpack.c.bf16 %v3378_v22, %v3378_v22 }
 0xc0c   : > { %v3381_v26 = vmul.f32 %v4978_v23, %v3346_v4  ;;  %v3384_v31 = vpack.c.bf16 %v3380_v24, %v3380_v24 }
 0xc0d   : > { %v3383_v28 = vpack.c.bf16 %v3379_v25, %v3379_v25 }
 0xc0e   : > { %v3385_v30 = vpack.c.bf16 %v3381_v26, %v3381_v26 }
 0xc0f   : > { %3681 = vmatprep.mubr.bf16.mxu1 %v3383_v28 }
 0xc10   : > { %3721 = vmatprep.mubr.bf16.mxu0 %v3385_v30  ;;  %3682 = vmatmul.mubr.bf16.vlgmr.msra.gmra.mxu1 %v3382_v29 }
 0xc11   : > { %3722 = vmatmul.mubr.bf16.vlgmr.msra.gmra.mxu0 %v3384_v31 }
 0xcd0   : > { %v4463_v32 = vpop.f32.mrf.mxu1 }
 0xcd1   : > { %v4485_v33 = vpop.f32.mrf.mxu0 }
 0xcd2   : > { %v4464_v34 = vpop.f32.mrf.mxu1 }
 0xcd3   : > { %v4465_v35 = vadd.f32 %v4464_v34, %v4463_v32  ;;  %v4486_v36 = vpop.f32.mrf.mxu0 }
 0xcd4   : > { %v4466_v37 = vpop.f32.mrf.mxu1  ;;  %v4487_v41 = vadd.f32 %v4486_v36, %v4485_v33 }
 0xcd5   : > { %v3684_v40 = vadd.f32 %v4465_v35, %v4299_v57  ;;  %v4488_v42 = vpop.f32.mrf.mxu0 }
 0xcd6   : > { %v4467_v44 = vpop.f32.mrf.mxu1 }
 0xcd7   : > { %v3724_v46 = vadd.f32 %v4487_v41, %v3684_v40  ;;  %v4489_v47 = vpop.f32.mrf.mxu0  ;;  %3734 = sbr.rel (%p4332_p13) target bundleno = 3808 (0xee0), region = 144 }
 0xcd9   : > { %v3729_v48 = vadd.f32 %v3724_v46, %v6019_v27 }
 0xcdb   : > { %3730 = vst [vmem:[#allocation2] sm:$0xff] %v3729_v48 }
 0xcdc   : > { %vm3738_vm6 = vcmask 1040384   ;;  %v4980_v51 = vld [vmem:[#allocation14 + $0x38] sm:$0xff]   ;;  %v5341_v52 = vmov 0.0   ;;  %v4981_v54 = vld [vmem:[#allocation14 + $0x30] sm:$0xff]   ;;  %v4982_v59 = vld [vmem:[#allocation14 + $0x28] sm:$0xff]   ;;  %vm5342_vm7 = vmmov 0  }
 0xcdd   : > { %4588 = vmatprep.subr.bf16.mxu0 %v5341_v52  ;;  %v4983_v60 = vld [vmem:[#allocation14 + $0x20] sm:$0xff]   ;;  %4604 = vmatprep.mubr.msk.bf16.mxu0 %vm5342_vm7, %v5341_v52  ;;  %v4984_v61 = vld [vmem:[#allocation14 + $0x18] sm:$0xff]   ;;  %v4985_v63 = vld [vmem:[#allocation14 + $0x10] sm:$0xff]  }
 0xcde   : > { %4589 = vmatpush3.bf16.msra.mxu0 %v4980_v51  ;;  %v4986_v1 = vld [vmem:[#allocation14 + $0x8] sm:$0xff]   ;;  %v4987_v2 = vld [vmem:[#allocation14] sm:$0xff]   ;;  %v3736_v5 = vld [vmem:[%s6293_s0] sm:$0x1] }
 0xcdf   : > { %4590 = vmatprep.subr.bf16.mxu0 %v5341_v52  ;;  %v3737_v16 = vld [vmem:[%s6294_s20] sm:$0x1] }
 0xce2   : > { %v3735_v49 = vld [vmem:[#allocation2] sm:$0x1]  ;;  %4591 = vmatpush3.bf16.msra.mxu0 %v4981_v54 }
 0xce3   : > { %v3739_v50 = vsel %vm3738_vm6, %v3735_v49, 0.0  ;;  %4592 = vmatprep.subr.bf16.mxu0 %v5341_v52 }
 0xce4   : > { %3740 = vadd.xlane.f32.xlu0 %v3739_v50 }
 0xce6   : > { %4593 = vmatpush3.bf16.msra.mxu0 %v4982_v59 }
 0xce7   : > { %4594 = vmatprep.subr.bf16.mxu0 %v5341_v52 }
 0xcea   : > { %4595 = vmatpush3.bf16.msra.mxu0 %v4983_v60 }
 0xceb   : > { %4596 = vmatprep.subr.bf16.mxu0 %v5341_v52 }
 0xcee   : > { %4597 = vmatpush3.bf16.msra.mxu0 %v4984_v61 }
 0xcef   : > { %4598 = vmatprep.subr.bf16.mxu0 %v5341_v52 }
 0xcf2   : > { %4599 = vmatpush3.bf16.msra.mxu0 %v4985_v63 }
 0xcf3   : > { %4600 = vmatprep.subr.bf16.mxu0 %v5341_v52 }
 0xcf6   : > { %4601 = vmatpush3.bf16.msra.mxu0 %v4986_v1 }
 0xcf7   : > { %4602 = vmatprep.subr.bf16.mxu0 %v5341_v52 }
 0xcfa   : > { %4603 = vmatpush3.bf16.msra.mxu0 %v4987_v2 }
 0xd6d   : > { %v3741_v15 = vpop.xlane.xlu0 %3740 }
 0xd6e   : > { %v3742_v19 = vmul.f32 0.0078125, %v3741_v15 }
 0xd70   : > { %v3743_v56 = vsub.f32 %v3735_v49, %v3742_v19 }
 0xd72   : > { %v3744_v27 = vmul.f32 %v3743_v56, %v3743_v56 }
 0xd74   : > { %v3745_v58 = vsel %vm3738_vm6, %v3744_v27, 0.0 }
 0xd75   : > { %3746 = vadd.xlane.f32.xlu0 %v3745_v58 }
 0xdfe   : > { %v3747_v53 = vpop.xlane.xlu0 %3746 }
 0xdff   : > { %v3748_v55 = vmul.f32 0.0078125, %v3747_v53 }
 0xe01   : > { %v3749_v3 = vadd.f32 1e-05, %v3748_v55 }
 0xe03   : > { %4988 = vrsqrt.f32 %v3749_v3 }
 0xe10   : > { %v4989_v4 = vpop.eup %4988 }
 0xe11   : > { %v3751_v6 = vmul.f32 %v4989_v4, %v3743_v56 }
 0xe13   : > { %v3752_v38 = vmul.f32 %v3751_v6, %v3736_v5 }
 0xe15   : > { %v3753_v7 = vadd.f32 %v3752_v38, %v3737_v16 }
 0xe17   : > { %v3754_v43 = vpack.c.bf16 %v3753_v7, %v3753_v7 }
 0xe19   : > { %4605 = vmatmul.mubr.bf16.vlgmr.msra.gmra.mxu0 %v3754_v43 }
 0xed9   : > { %v3853_v8 = vpop.f32.mrf.mxu0 }
 0xeda   : > { %3859 = vst [vmem:[%s5765_s13] sm:$0x1] %v3853_v8 }
 0xedb   : > { %v4606_v13 = vpop.f32.mrf.mxu0 }
 0xedd   : > { %v3856_v14 = vpop.f32.mrf.mxu0 }
 0xedf   : > { %v4607_v9 = vpop.f32.mrf.mxu0 }
 0xee0 PF: > { %s4341_s23 = sshll.u32 %s5306_s1, 4  ;;  %s6296_s9 = sld [smem:[#allocation56_spill]] }
 0xee1   : > { %s3873_s10 = sshll.u32 %s5765_s13, 4  ;;  %s6297_s15 = sand.u32 1, %s5282_s28   ;;  %s3874_s10 = int_to_ptr.vmem [resolvable:$true] %s3873_s10 }
 0xee2   : > { %s3861_s19 = scalar_lea.sflag [#allocation5], %s6297_s15  ;;  %s5182_s8 = scalar_lea.vmem %s3874_s10, 16 }
 0xee3   : > { %p5183_p8 = scmp.ne.s32.totalorder %s3874_s10, %s5182_s8  ;;  %s5343_s6 = smov [#allocation15]  }
 0xee4   : > { %s5186_s16 = sshll.u32 %s5343_s6, 4  ;;  %s5187_s16 = int_to_ptr.vmem [resolvable:$false] %s5186_s16 }
 0xee5   : > { %p5184_p10 = pnand %p5183_p8, %p5530_p7  ;;  %s5188_s21 = scalar_lea.vmem %s5187_s16, 32 }
 0xee6   : > { %s3871_s30 = scalar_lea.hbm %s6296_s9, %s4341_s23  ;;  %p5189_p2 = scmp.lt.s32.totalorder %s3874_s10, %s5187_s16 }
 0xee7   : > { %p5185_p0 = pneg %p5184_p10  ;;  %p5190_p1 = scmp.lt.s32.totalorder %s5188_s21, %s5182_s8 }
 0xee9   : > { %p5191_p4 = por %p5190_p1, %p5189_p2 }
 0xeeb   : > { %p5192_p12 = pnand %p5191_p4, %p5185_p0 }
 0xeed   : > { %5195 = shalt.err (!%p5192_p12)
}
 0xeee   : > { %s5196_s1 = scalar_lea.hbm %s3871_s30, 16  ;;  %s5200_s25 = scalar_lea.hbm %s6296_s9, 32 }
 0xeef   : > { %p5197_p11 = scmp.ne.s32.totalorder %s3871_s30, %s5196_s1  ;;  %p5201_p6 = scmp.lt.s32.totalorder %s3871_s30, %s6296_s9 }
 0xef0   : > { %p5202_p3 = scmp.lt.s32.totalorder %s5200_s25, %s5196_s1 }
 0xef1   : > { %p5198_p9 = pnand %p5197_p11, %p5530_p7 }
 0xef2   : > { %p5203_p13 = por %p5202_p3, %p5201_p6 }
 0xef3   : > { %p5199_p5 = pneg %p5198_p9 }
 0xef5   : > { %p5204_p8 = pnand %p5203_p13, %p5199_p5 }
 0xef7   : > { %5207 = shalt.err (!%p5204_p8)
}
 0xef8   : > { %4631 = dma.vmem_to_hbm [thread:$0]  (%p5530_p7), %s3874_s10, 16, %s3871_s30, %s3861_s19  }
 0xef9 PF: > { %s6298_s29 = sld [smem:[#allocation28_spill]] }
 0xefa   : > { %s6299_s18 = sld [smem:[#allocation22_spill]] }
 0xefb   : > { %s6300_s7 = sld [smem:[#allocation30_spill]] }
 0xeff   : > { %p4665_p10 = scmp.ge.s32.totalorder %s6298_s29, 2 }
 0xf00   : > { %s3885_s22 = sand.u32 1, %s6299_s18  }
 0xf01   : > { %p6301_p0 = scmp.ne.s32.totalorder %s6300_s7, 0  ;;  %s3886_s0 = scalar_lea.sflag [#allocation5], %s3885_s22 }
 0xf03   : > { %p4657_p2 = pnand %p4665_p10, %p6301_p0 }
 0xf05   : > { %p4658_p1 = pneg %p4657_p2 }
 0xf07   : > { %5273 = dma.done.wait (%p4658_p1), %s3886_s0, 16  }
 0xf08   : > { %5275 = vsyncadd (%p4658_p1), %s3886_s0, 4294967280  ;;  %s45_s6 = sadd.s32 1, %s6298_s29   ;;  %s6302_s2 = sld [smem:[#allocation23_spill]] }
 0xf09   : > { %p42_p4 = scmp.ge.s32.totalorder %s45_s6, 6   ;;  %s6303_s29 = sld [smem:[#allocation34_spill]] }
 0xf0a   : > { %s6304_s20 = sld [smem:[#allocation24_spill]]  ;;  %s6310_s3 = smov %s5282_s28 }
 0xf0b   : > { %s6305_s0 = sld [smem:[#allocation33_spill]]  ;;  %s6312_s30 = smov %s5294_s4 }
 0xf0c   : > { %s6306_s23 = sld [smem:[#allocation26_spill]]  ;;  %44 = sbr.rel (!%p42_p4) target bundleno = 37 (0x25), region = 242 }
 0xf0d   : > { %s6307_s1 = sld [smem:[#allocation27_spill]] }
 0xf0e   : > { %s6308_s5 = sld [smem:[#allocation31_spill]]  ;;  %s6311_s28 = smov %s6302_s2 }
 0xf0f   : > { %s6309_s24 = sld [smem:[#allocation32_spill]] }
 0xf10   : > { %s6313_s4 = smov %s6304_s20 }
 0xf11   :  { %3890 = vsyncpa [#allocation4], 1 }
 0xf12   :  { %3892 = vsyncpa [#allocation4 + $0x1], 1 }
 0xf13   :  { %3893 = vsyncpa [#allocation7], 1 }
 0xf14   :  { %3895 = vsyncpa [#allocation7 + $0x1], 1 }
 0xf15   :  { %3896 = vsyncpa [#allocation10], 1 }
 0xf16   :  { %3898 = vsyncpa [#allocation10 + $0x1], 1 }
 0xf17   :  { %3899 = vsyncpa [#allocation13], 1 }
 0xf18   :  { %3901 = vsyncpa [#allocation13 + $0x1], 1 }
 0xf19   :  { %3902 = vsyncpa [#allocation5], 1 }
 0xf1a   :  { %3904 = vsyncpa [#allocation5 + $0x1], 1 }

</bundles_post_ra>
